<compile_context>
chip_gen: v6e
topology: v6e:2x2x1
jax: 0.10.0
libtpu: 0.0.40
codegen_flags: <defaults>
</compile_context>

<pallas_src>
import functools

import jax
import jax.numpy as jnp
from jax.experimental import pallas as pl
from jax.experimental.pallas import tpu as pltpu

MARGIN = 0.4  # nn.MarginRankingLoss(margin=0.4) is hard-coded in the module's __init__


def _triplet_loss_tile_kernel(m_ref, q_ref, qlabels_ref, o_ref, *,
                              num_valid_rows, margin):
    m = m_ref[...]            # (TM, D) f32  — tile of model embeddings
    q = q_ref[...]            # (B,  D) f32
    qlab = qlabels_ref[...]   # (1,  B) int32
    tm = m.shape[0]
    b = q.shape[0]

    # scores = m @ q^T, contracting dim 1 of both operands (no transpose of q).
    scores = jax.lax.dot_general(
        m, q, dimension_numbers=(((1,), (1,)), ((), ())),
        preferred_element_type=jnp.float32)                        # (TM, B)

    # Two shared 3-D iotas, reused by both logical passes.
    col_idx = jax.lax.broadcasted_iota(jnp.int32, (tm, b, b), 2)   # index "a" / "j"
    row_idx = jax.lax.broadcasted_iota(jnp.int32, (tm, b, b), 1)   # index "c" / "k"

    # Descending-argsort rank with index tie-break:
    #   ranks[i, c] = #{a : scores[i,a] > scores[i,c] or (== and a < c)}
    s_c = scores[:, :, None]                                       # (TM, B, 1)
    s_a = scores[:, None, :]                                       # (TM, 1, B)
    greater = (s_a > s_c) | ((s_a == s_c) & (col_idx < row_idx))
    ranks = jnp.sum(greater.astype(jnp.int32), axis=-1)            # (TM, B)

    # Hinge table hv[k, j]: the MarginRankingLoss element produced if sorted position k
    # holds original column j, i.e. relu(-target * (j - qlabels[k]) + margin).
    j2 = jax.lax.broadcasted_iota(jnp.int32, (1, b, b), 2)
    d = (j2 - qlab[:, :, None]).astype(jnp.float32)                # (1, B, B)
    tgt = jnp.where(d <= 0.0, 1.0, -1.0)
    hv = jnp.maximum(0.0, -tgt * d + margin)                       # (1, B, B)

    # Fused pass: sorted_indices[i, k] == j  <=>  ranks[i, j] == k.  Accumulate the
    # hinge values through the one-hot directly (no explicit sorted_indices tensor).
    eq = ranks[:, None, :] == row_idx                              # (TM, B, B)
    contrib = jnp.where(eq, hv, 0.0)                               # (TM, B, B) f32

    # Mask rows that only exist because M was padded up to a multiple of TM.
    row0 = pl.program_id(0) * tm
    gids = row0 + jax.lax.broadcasted_iota(jnp.int32, (tm, 1, 1), 0)
    valid_f = (gids < num_valid_rows).astype(jnp.float32)          # (TM, 1, 1)
    partial = jnp.sum(contrib * valid_f)

    # Lane-dense (1, 8, 128) output block: partial sum at [0,0,0], zeros elsewhere
    # (single unmasked dense store instead of a (1,1) masked partial store).
    r8 = jax.lax.broadcasted_iota(jnp.int32, (1, 8, 128), 1)
    c128 = jax.lax.broadcasted_iota(jnp.int32, (1, 8, 128), 2)
    o_ref[...] = jnp.where((r8 == 0) & (c128 == 0), partial, 0.0)


def triplet_loss_cosine(m, q, mlabels, qlabels, *, margin=MARGIN, tm=None,
                        vmem_temp_budget_bytes=8 << 20):
    """Forward of TripletLossCosine1. `mlabels` is unused (matches the PyTorch code)."""
    del mlabels
    m = m.astype(jnp.float32)
    q = q.astype(jnp.float32)
    num_models, dim = m.shape
    batch, _ = q.shape
    qlab2d = qlabels.astype(jnp.int32).reshape(1, batch)

    # Row-tile size: ~4 live f32 (tm, B, B)-sized temporaries dominate in-kernel VMEM;
    # size them against a budget that fits v7x (64 MiB physical / 32 MiB scoped) as
    # well as v5e/v6e.  `tm` is kept a multiple of 8 (sublane alignment).
    if tm is None:
        tm = vmem_temp_budget_bytes // (4 * batch * batch * 4)
    tm = int(max(8, min(tm, 512)))
    tm = (tm // 8) * 8
    tm = min(tm, ((num_models + 7) // 8) * 8)

    num_tiles = pl.cdiv(num_models, tm)
    m_pad = num_tiles * tm
    if m_pad != num_models:
        m = jnp.pad(m, ((0, m_pad - num_models), (0, 0)))

    kernel = functools.partial(_triplet_loss_tile_kernel,
                               num_valid_rows=num_models, margin=margin)
    partials = pl.pallas_call(
        kernel,
        out_shape=jax.ShapeDtypeStruct((num_tiles, 8, 128), jnp.float32),
        grid=(num_tiles,),
        in_specs=[
            pl.BlockSpec((tm, dim), lambda i: (i, 0)),
            pl.BlockSpec((batch, dim), lambda i: (0, 0)),
            pl.BlockSpec((1, batch), lambda i: (0, 0)),
        ],
        out_specs=pl.BlockSpec((1, 8, 128), lambda i: (i, 0, 0)),
        compiler_params=pltpu.CompilerParams(
            dimension_semantics=("parallel",),   # per-tile partials -> both v7x TCs
            vmem_limit_bytes=32 << 20,
        ),
    )(m, q, qlab2d)

    # Final reduction and the single division by M*B happen once, outside the grid.
    return jnp.sum(partials[:, 0, 0]) / (num_models * batch)


def _reference(m, q, qlabels, margin=MARGIN):
    """Pure-JAX mirror of the PyTorch forward (stable index tie-break, as in the kernel)."""
    scores = jax.lax.dot_general(
        m.astype(jnp.float32), q.astype(jnp.float32),
        dimension_numbers=(((1,), (1,)), ((), ())),
        precision=jax.lax.Precision.HIGHEST,
        preferred_element_type=jnp.float32)
    sorted_indices = jnp.argsort(-scores, axis=1).astype(jnp.int32)
    rank_diff = sorted_indices - qlabels[None, :].astype(jnp.int32)
    target = (rank_diff <= 0).astype(jnp.float32) * 2.0 - 1.0
    return jnp.mean(jnp.maximum(0.0, -target * rank_diff.astype(jnp.float32) + margin))


if __name__ == "__main__":
    key = jax.random.PRNGKey(0)
    k1, k2, k3, k4 = jax.random.split(key, 4)

    num_models, batch, dim = 40, 8, 32
    # Quantize inputs to multiples of 1/8 in [-4, 4] so the score matmul is exact under
    # every TPU matmul path (bf16 inputs / f32 accumulation); the rank comparison
    # against the reference then cannot flip on rounding near-ties.
    m = jnp.clip(jnp.round(jax.random.normal(k1, (num_models, dim), dtype=jnp.float32) * 8.0) / 8.0, -4.0, 4.0)
    q = jnp.clip(jnp.round(jax.random.normal(k2, (batch, dim), dtype=jnp.float32) * 8.0) / 8.0, -4.0, 4.0)
    mlabels = jax.random.randint(k3, (num_models,), 0, batch, dtype=jnp.int32)
    qlabels = jax.random.randint(k4, (batch,), 0, batch, dtype=jnp.int32)

    # tm=16 -> 3 tiles over 40 rows (last tile row-masked): exercises the grid,
    # megacore-parallel partials, and the padded-row mask.
    loss = triplet_loss_cosine(m, q, mlabels, qlabels, tm=16)
    jax.block_until_ready(loss)

    ref = _reference(m, q, qlabels)
    assert jnp.allclose(loss, ref, atol=1e-5, rtol=1e-5), (float(loss), float(ref))
    print("KERNEL_OK")
</pallas_src>

<mosaic_0001>
module attributes {stable_mosaic.version = 11 : i64} {
  func.func @_triplet_loss_tile_kernel(%arg0: i32, %arg1: memref<16x32xf32, #tpu.memory_space<vmem>>, %arg2: memref<8x32xf32, #tpu.memory_space<vmem>>, %arg3: memref<1x8xi32, #tpu.memory_space<vmem>>, %arg4: memref<1x8x128xf32, #tpu.memory_space<vmem>>) attributes {dimension_semantics = [#tpu.dimension_semantics<parallel>], iteration_bounds = array<i64: 3>, scalar_prefetch = 0 : i64, scratch_operands = 0 : i64, tpu.core_type = #tpu.core_type<tc>, window_params = [{transform_indices = @transform_0, window_bounds = array<i64: 16, 32>}, {pipeline_mode = #tpu.pipeline_mode<synchronous>, transform_indices = @transform_1, window_bounds = array<i64: 8, 32>}, {pipeline_mode = #tpu.pipeline_mode<synchronous>, transform_indices = @transform_2, window_bounds = array<i64: 1, 8>}, {transform_indices = @transform_3, window_bounds = array<i64: 1, 8, 128>}]} {
    %c0 = arith.constant 0 : index
    %c0_0 = arith.constant 0 : index
    %0 = vector.load %arg1[%c0, %c0_0] : memref<16x32xf32, #tpu.memory_space<vmem>>, vector<16x32xf32>
    %c0_1 = arith.constant 0 : index
    %c0_2 = arith.constant 0 : index
    %1 = vector.load %arg2[%c0_1, %c0_2] : memref<8x32xf32, #tpu.memory_space<vmem>>, vector<8x32xf32>
    %c0_3 = arith.constant 0 : index
    %c0_4 = arith.constant 0 : index
    %2 = vector.load %arg3[%c0_3, %c0_4] : memref<1x8xi32, #tpu.memory_space<vmem>>, vector<1x8xi32>
    %cst = arith.constant dense<0.000000e+00> : vector<16x8xf32>
    %3 = tpu.matmul %0, %1, %cst {dimension_numbers = #tpu.dot_dimension_numbers<[1], [1], [0], [0], [0, 0, 1, 0], [], []>} : vector<16x32xf32>, vector<8x32xf32>, vector<16x8xf32> -> vector<16x8xf32>
    %4 = tpu.iota {dimensions = array<i32: 2>} : vector<16x8x8xi32>
    %5 = tpu.iota {dimensions = array<i32: 1>} : vector<16x8x8xi32>
    %6 = vector.shape_cast %3 : vector<16x8xf32> to vector<16x8x1xf32>
    %7 = vector.shape_cast %3 : vector<16x8xf32> to vector<16x1x8xf32>
    %8 = vector.broadcast %7 : vector<16x1x8xf32> to vector<16x8x8xf32>
    %9 = vector.broadcast %6 : vector<16x8x1xf32> to vector<16x8x8xf32>
    %10 = arith.cmpf ogt, %8, %9 : vector<16x8x8xf32>
    %11 = vector.broadcast %7 : vector<16x1x8xf32> to vector<16x8x8xf32>
    %12 = vector.broadcast %6 : vector<16x8x1xf32> to vector<16x8x8xf32>
    %13 = arith.cmpf oeq, %11, %12 : vector<16x8x8xf32>
    %14 = arith.cmpi slt, %4, %5 : vector<16x8x8xi32>
    %15 = arith.andi %13, %14 : vector<16x8x8xi1>
    %16 = arith.ori %10, %15 : vector<16x8x8xi1>
    %17 = arith.extui %16 : vector<16x8x8xi1> to vector<16x8x8xi32>
    %cst_5 = arith.constant dense<0> : vector<16x8xi32>
    %18 = vector.multi_reduction <add>, %17, %cst_5 [2] : vector<16x8x8xi32> to vector<16x8xi32>
    %19 = tpu.iota {dimensions = array<i32: 2>} : vector<1x8x8xi32>
    %20 = vector.shape_cast %2 : vector<1x8xi32> to vector<1x8x1xi32>
    %21 = vector.broadcast %20 : vector<1x8x1xi32> to vector<1x8x8xi32>
    %22 = arith.subi %19, %21 : vector<1x8x8xi32>
    %23 = arith.sitofp %22 : vector<1x8x8xi32> to vector<1x8x8xf32>
    %cst_6 = arith.constant 0.000000e+00 : f32
    %24 = vector.broadcast %cst_6 : f32 to vector<1x8x8xf32>
    %25 = arith.cmpf ole, %23, %24 : vector<1x8x8xf32>
    %cst_7 = arith.constant 1.000000e+00 : f32
    %cst_8 = arith.constant -1.000000e+00 : f32
    %26 = vector.broadcast %cst_7 : f32 to vector<1x8x8xf32>
    %27 = vector.broadcast %cst_8 : f32 to vector<1x8x8xf32>
    %28 = arith.select %25, %26, %27 : vector<1x8x8xi1>, vector<1x8x8xf32>
    %cst_9 = arith.constant 0.000000e+00 : f32
    %29 = vector.broadcast %cst_9 : f32 to vector<1x8x8xf32>
    %30 = arith.subf %29, %28 : vector<1x8x8xf32>
    %31 = arith.mulf %30, %23 : vector<1x8x8xf32>
    %cst_10 = arith.constant 4.000000e-01 : f32
    %32 = vector.broadcast %cst_10 : f32 to vector<1x8x8xf32>
    %33 = arith.addf %31, %32 : vector<1x8x8xf32>
    %cst_11 = arith.constant 0.000000e+00 : f32
    %34 = vector.broadcast %cst_11 : f32 to vector<1x8x8xf32>
    %35 = arith.maximumf %34, %33 : vector<1x8x8xf32>
    %36 = vector.shape_cast %18 : vector<16x8xi32> to vector<16x1x8xi32>
    %37 = vector.broadcast %36 : vector<16x1x8xi32> to vector<16x8x8xi32>
    %38 = arith.cmpi eq, %37, %5 : vector<16x8x8xi32>
    %cst_12 = arith.constant 0.000000e+00 : f32
    %39 = vector.shape_cast %35 : vector<1x8x8xf32> to vector<1x8x8xf32>
    %40 = vector.broadcast %39 : vector<1x8x8xf32> to vector<16x8x8xf32>
    %41 = vector.broadcast %cst_12 : f32 to vector<16x8x8xf32>
    %42 = arith.select %38, %40, %41 : vector<16x8x8xi1>, vector<16x8x8xf32>
    %c16_i32 = arith.constant 16 : i32
    %43 = arith.muli %arg0, %c16_i32 : i32
    %44 = tpu.iota {dimensions = array<i32: 0>} : vector<16x1x1xi32>
    %45 = vector.broadcast %43 : i32 to vector<16x1x1xi32>
    %46 = arith.addi %45, %44 : vector<16x1x1xi32>
    %c40_i32 = arith.constant 40 : i32
    %47 = vector.broadcast %c40_i32 : i32 to vector<16x1x1xi32>
    %48 = arith.cmpi slt, %46, %47 : vector<16x1x1xi32>
    %49 = arith.extui %48 : vector<16x1x1xi1> to vector<16x1x1xi32>
    %50 = arith.sitofp %49 : vector<16x1x1xi32> to vector<16x1x1xf32>
    %51 = vector.broadcast %50 : vector<16x1x1xf32> to vector<16x8x8xf32>
    %52 = arith.mulf %42, %51 : vector<16x8x8xf32>
    %53 = vector.shape_cast %52 : vector<16x8x8xf32> to vector<1x16x8x8xf32>
    %cst_13 = arith.constant dense<0.000000e+00> : vector<1xf32>
    %54 = vector.multi_reduction <add>, %53, %cst_13 [1, 2, 3] : vector<1x16x8x8xf32> to vector<1xf32>
    %55 = vector.shape_cast %54 : vector<1xf32> to vector<1x1x1x1xf32>
    %56 = vector.extract %55[0, 0, 0, 0] : f32 from vector<1x1x1x1xf32>
    %57 = tpu.iota {dimensions = array<i32: 1>} : vector<1x8x128xi32>
    %58 = tpu.iota {dimensions = array<i32: 2>} : vector<1x8x128xi32>
    %c0_i32 = arith.constant 0 : i32
    %59 = vector.broadcast %c0_i32 : i32 to vector<1x8x128xi32>
    %60 = arith.cmpi eq, %57, %59 : vector<1x8x128xi32>
    %c0_i32_14 = arith.constant 0 : i32
    %61 = vector.broadcast %c0_i32_14 : i32 to vector<1x8x128xi32>
    %62 = arith.cmpi eq, %58, %61 : vector<1x8x128xi32>
    %63 = arith.andi %60, %62 : vector<1x8x128xi1>
    %cst_15 = arith.constant 0.000000e+00 : f32
    %64 = vector.broadcast %56 : f32 to vector<1x8x128xf32>
    %65 = vector.broadcast %cst_15 : f32 to vector<1x8x128xf32>
    %66 = arith.select %63, %64, %65 : vector<1x8x128xi1>, vector<1x8x128xf32>
    %c0_16 = arith.constant 0 : index
    %c0_17 = arith.constant 0 : index
    %c0_18 = arith.constant 0 : index
    %67 = vector.load %arg4[%c0_16, %c0_17, %c0_18] : memref<1x8x128xf32, #tpu.memory_space<vmem>>, vector<1x8x128xf32>
    tpu.vector_store %arg4[%c0_16, %c0_17, %c0_18], %66 {strides = array<i32>} : memref<1x8x128xf32, #tpu.memory_space<vmem>>, vector<1x8x128xf32>,
    return
  }
  func.func @transform_0(%arg0: i32) -> (i32, i32) {
    %c0_i32 = arith.constant 0 : i32
    %c0_i32_0 = arith.constant 0 : i32
    return %arg0, %c0_i32 : i32, i32
  }
  func.func @transform_1(%arg0: i32) -> (i32, i32) {
    %c0_i32 = arith.constant 0 : i32
    %c0_i32_0 = arith.constant 0 : i32
    %c0_i32_1 = arith.constant 0 : i32
    return %c0_i32, %c0_i32_0 : i32, i32
  }
  func.func @transform_2(%arg0: i32) -> (i32, i32) {
    %c0_i32 = arith.constant 0 : i32
    %c0_i32_0 = arith.constant 0 : i32
    %c0_i32_1 = arith.constant 0 : i32
    return %c0_i32, %c0_i32_0 : i32, i32
  }
  func.func @transform_3(%arg0: i32) -> (i32, i32, i32) {
    %c0_i32 = arith.constant 0 : i32
    %c0_i32_0 = arith.constant 0 : i32
    %c0_i32_1 = arith.constant 0 : i32
    return %arg0, %c0_i32, %c0_i32_0 : i32, i32, i32
  }
}

</mosaic_0001>

<bundles_post_ra>
// kernel: tpu_custom_call.1
= control target key start
LH: loop header
LB: loop body
LE: loop exit
PB: predicated region body
PF: predicated region fallthrough
CT: control target
= control target key end

     0   :  { %8 = vsyncpa [#allocation3], 0  ;;  %s4315_s0 = inlined_call_operand.vmem [shape: f32[48,32], index: 0, kind: input, shape index: {}]   ;;  %s4316_s1 = inlined_call_operand.vmem [shape: f32[8,32], index: 1, kind: input, shape index: {}]   ;;  %s4317_s2 = inlined_call_operand.vmem [shape: s32[1,8], index: 2, kind: input, shape index: {}]   ;;  %s4318_s3 = inlined_call_operand.hbm [shape: f32[3,8,128], index: 3, kind: output, shape index: {}]  }
   0x1   :  { %10 = vsyncpa [#allocation3 + $0x1], 0  ;;  %s2859_s12 = smov 0   ;;  %s2861_s13 = smov 0  }
   0x2   :  { %s2863_s14 = smov 0   ;;  %s2865_s15 = smov 0  }
   0x3 LB: > { %s2880_s16 = sadd.s32 4294967295, %s2832_s15   ;;  %s2685_s17 = sadd.s32 4294967294, %s2832_s15   ;;  %s2832_s15 = sphi %s2865_s15, %s4380_s15   ;;  %s2828_s14 = sphi %s2863_s14, %s4379_s14   ;;  %s2824_s13 = sphi %s2861_s13, %s4378_s13   ;;  %s2820_s12 = sphi %s2859_s12, %s4377_s12  }
   0x4   : > { %s2884_s18 = sadd.s32 1, %s2832_s15   ;;  %s91_s19 = sadd.s32 1, %s2828_s14 }
   0x5   : > { %s88_s20 = ssub.s32 %s2832_s15, %s2884_s18  ;;  %p101_p0 = scmp.ne.s32.totalorder %s2828_s14, %s2824_s13 }
   0x6   : > { %p89_p1 = scmp.eq.s32.totalorder %s88_s20, 0  ;;  %p102_p2 = scmp.eq.s32.totalorder %s2880_s16, 2 }
   0x7   : > { %p107_p3 = scmp.ne.s32.totalorder %s2824_s13, %s2820_s12  ;;  %p108_p4 = scmp.eq.s32.totalorder %s2685_s17, 2 }
   0x8   : > { %s2895_s21 = scalar_select %p89_p1, %s2828_s14, %s91_s19  }
   0x9   : > { %p2897_p5 = por %p102_p2, %p101_p0  ;;  %p2901_p6 = por %p108_p4, %p107_p3 }
   0xa   : > { %p2688_p7 = scmp.ge.s32.totalorder %s2832_s15, 1  ;;  %p141_p8 = scmp.lt.s32.totalorder %s2832_s15, 4 }
   0xc   : > { %p142_p9 = pnand %p2688_p7, %p141_p8 }
   0xe   : > { %145 = sbr.rel (%p142_p9) target bundleno = 1097 (0x449), region = 32 }
  0x13   : > { %v173_v0 = vld [vmem:[%s4316_s1] sm:$0xff]  ;;  %vm175_vm0 = vcmask 261120   ;;  %s2690_s26 = sshll.u32 %s2880_s16, 1  ;;  %v260_v4 = vlaneseq  ;;  %v2834_v9 = vmov -1.0   ;;  %v2835_v32 = vmov 0   ;;  %s2696_s6 = sshll.u32 %s2880_s16, 4 }
  0x14   : > { %v2695_v1 = vld [vmem:[%s4317_s2] ss:$0 sm:$0xff]  ;;  %2720 = vmatprep.subr.msk.mxu0 %vm175_vm0, %v173_v0  ;;  %p166_p10 = scmp.lt.s32.totalorder %s2690_s26, 5  ;;  %2771 = vset.pattern.permute.xlu1 %v2835_v32  ;;  %v2836_v51 = vmov 1966171168   ;;  %vm637_vm8 = vcmask 64512  }
  0x15   : > { %851 = vbcast.lane.b32.xlu1 %v2695_v1, 256  ;;  %2721 = vmatpush3.xpose.msk.msra.mxu0 %vm175_vm0, %v173_v0  ;;  %v2917_v5 = vand.u32 127, %v260_v4  ;;  %v2920_v11 = vshrl.u32 %v260_v4, 7  ;;  %v380_v52 = vunpack.c.l.s4 %v2836_v51  ;;  %s162_s7 = sand.u32 1, %s2824_s13   ;;  %s2714_s9 = sshll.u32 %s2880_s16, 7 }
  0x16   : > { %s4382_s26 = smov (!%p166_p10, %s2690_s26), 5  ;;  %2770 = vset.pattern.permute.xlu0 %v2835_v32  ;;  %s2689_s8 = sshll.u32 %s162_s7, 3 }
  0x17   : > { %s2691_s29 = sshll.u32 %s4382_s26, 3  ;;  %4328 = vst [vmem:[#allocation5_spill] sm:$0xff] %v2917_v5  ;;  %4329 = vst [vmem:[#allocation6_spill] sm:$0xff] %v2920_v11  ;;  %v2923_v15 = vsub.s32 1, %v2920_v11  ;;  %v2926_v16 = vsub.s32 0, %v2920_v11  ;;  %v2929_v18 = vsub.s32 2, %v2920_v11  ;;  %v381_v55 = vunpack.c.0.s8 %v380_v52  ;;  %s4280_s24 = scalar_lea.hbm %s4318_s3, %s2714_s9 }
  0x18   : > { %s169_s5 = scalar_lea.vmem %s4315_s0, %s2691_s29  ;;  %v2932_v19 = vsub.s32 3, %v2920_v11  ;;  %v2939_v24 = vsub.s32 4, %v2920_v11  ;;  %v2942_v25 = vsub.s32 5, %v2920_v11  ;;  %v2947_v28 = vsub.s32 6, %v2920_v11  ;;  %s164_s10 = scalar_lea.vmem [#allocation2], %s2689_s8 }
  0x19   : > { %v171_v2 = vld [vmem:[%s169_s5] sm:$0xff]  ;;  %v172_v3 = vld [vmem:[%s169_s5 + $0x8] sm:$0xff]  ;;  %v2950_v29 = vsub.s32 7, %v2920_v11  ;;  %v2987_v56 = vsub.s32 %v381_v55, %v2920_v11  ;;  %vm3007_vm2 = vcmp.lt.s32.totalorder %v2917_v5, %v2920_v11  ;;  %s2626_s11 = sshll.u32 %s164_s10, 4  ;;  %s2613_s25 = scalar_lea.sflag [#allocation3], %s162_s7  ;;  %s2627_s11 = int_to_ptr.vmem [resolvable:$true] %s2626_s11 }
  0x1a   : > { %2722 = vmatprep.mubr.msk.f32.mxu0 %vm175_vm0, %v171_v2  ;;  %s2772_s26 = scalar_lea.vmem %s2627_s11, 128  ;;  %s2838_s16 = smov [#allocation2]  }
  0x1b   : > { %2723 = vmatmul.mubr.msk.f32.vlgmr.msra.gmra.mxu0 %vm175_vm0, %v172_v3  ;;  %p2773_p11 = scmp.ne.s32.totalorder %s2627_s11, %s2772_s26  ;;  %s2776_s27 = sshll.u32 %s2838_s16, 4  ;;  %s2777_s27 = int_to_ptr.vmem [resolvable:$false] %s2776_s27 }
  0x1c   : > { %s2778_s28 = scalar_lea.vmem %s2777_s27, 256  ;;  %p2779_p0 = scmp.lt.s32.totalorder %s2627_s11, %s2777_s27 }
  0x1d   : > { %p2774_p12 = pnand %p2773_p11, %p2897_p5  ;;  %p2780_p1 = scmp.lt.s32.totalorder %s2778_s28, %s2772_s26 }
  0x1f   : > { %p2775_p13 = pneg %p2774_p12  ;;  %p2781_p2 = por %p2780_p1, %p2779_p0 }
  0x21   : > { %p2782_p3 = pnand %p2781_p2, %p2775_p13 }
  0x87   : > { %v852_v6 = vpop.permute.xlu1 %851 }
  0x88   : > { %v853_v7 = vsub.s32 %v2917_v5, %v852_v6 }
  0x8a   : > { %v854_v8 = vcvt.s32.f32 %v853_v7 }
  0x8c   : > { %vm855_vm1 = vcmp.le.f32.partialorder %v854_v8, 0.0 }
  0x8d   : > { %v856_v10 = vsel %vm855_vm1, 1.0, %v2834_v9 }
  0x8e   : > { %v857_v12 = vsub.f32 0.0, %v856_v10 }
  0x90   : > { %v858_v13 = vmul.f32 %v857_v12, %v854_v8 }
  0x92   : > { %v859_v14 = vadd.f32 0.4, %v858_v13 }
  0x94   : > { %v860_v17 = vmax.f32 %v859_v14, 0.0 }
  0x96   : > { %v1032_v20 = vrot.slane %v860_v17, %v2923_v15  ;;  %v1025_v21 = vrot.slane %v860_v17, %v2926_v16  ;;  %v1039_v22 = vrot.slane %v860_v17, %v2929_v18  ;;  %v1046_v23 = vrot.slane %v860_v17, %v2932_v19 }
  0x97   : > { %v1053_v26 = vrot.slane %v860_v17, %v2939_v24  ;;  %v1060_v27 = vrot.slane %v860_v17, %v2942_v25  ;;  %v1067_v30 = vrot.slane %v860_v17, %v2947_v28  ;;  %v1074_v31 = vrot.slane %v860_v17, %v2950_v29 }
  0x98   : > { %1034 = vbcast.lane.b32.xlu1 %v1032_v20, 256  ;;  %1027 = vbcast.lane.b32.xlu0 %v1025_v21, 256 }
  0x9c   : > { %1041 = vbcast.lane.b32.xlu1 %v1039_v22, 256  ;;  %1048 = vbcast.lane.b32.xlu0 %v1046_v23, 256 }
  0xa0   : > { %1055 = vbcast.lane.b32.xlu1 %v1053_v26, 256  ;;  %1062 = vbcast.lane.b32.xlu0 %v1060_v27, 256 }
  0xa4   : > { %1069 = vbcast.lane.b32.xlu1 %v1067_v30, 256  ;;  %1076 = vbcast.lane.b32.xlu0 %v1074_v31, 256 }
  0xdb   : > { %v2724_v33 = vpop.f32.mrf.mxu0 }
  0xdc   : > { %v330_v34 = vrot.slane %v2724_v33, %v2923_v15  ;;  %v323_v35 = vrot.slane %v2724_v33, %v2926_v16  ;;  %v344_v36 = vrot.slane %v2724_v33, %v2932_v19  ;;  %v337_v37 = vrot.slane %v2724_v33, %v2929_v18 }
  0xdd   : > { %v358_v38 = vrot.slane %v2724_v33, %v2942_v25  ;;  %v351_v39 = vrot.slane %v2724_v33, %v2939_v24  ;;  %v372_v40 = vrot.slane %v2724_v33, %v2950_v29  ;;  %v365_v41 = vrot.slane %v2724_v33, %v2947_v28  ;;  %v2964_v42 = vpop.f32.mrf.mxu0 }
  0xde   : > { %332 = vbcast.lane.b32.xlu1 %v330_v34, 256  ;;  %325 = vbcast.lane.b32.xlu0 %v323_v35, 256  ;;  %v281_v43 = vrot.slane %v2964_v42, %v2929_v18  ;;  %v267_v44 = vrot.slane %v2964_v42, %v2926_v16  ;;  %v288_v45 = vrot.slane %v2964_v42, %v2932_v19 }
  0xdf   : > { %v274_v46 = vrot.slane %v2964_v42, %v2923_v15  ;;  %v302_v47 = vrot.slane %v2964_v42, %v2942_v25  ;;  %v295_v48 = vrot.slane %v2964_v42, %v2939_v24  ;;  %v316_v49 = vrot.slane %v2964_v42, %v2950_v29 }
  0xe0   : > { %v309_v50 = vrot.slane %v2964_v42, %v2947_v28  ;;  %v434_v59 = vrot.slane %v2724_v33, %v2987_v56  ;;  %v427_v63 = vcombine.high %v2724_v33, %v2724_v33  ;;  %v385_v52 = vrot.slane %v2964_v42, %v2987_v56 }
  0xe2   : > { %346 = vbcast.lane.b32.xlu1 %v344_v36, 256  ;;  %339 = vbcast.lane.b32.xlu0 %v337_v37, 256  ;;  %v442_v62 = vcombine.high %v434_v59, %v434_v59  ;;  %v450_v0 = vrot.slane %v434_v59, %v2987_v56  ;;  %v441_v2 = vrot.slane %v427_v63, %v2987_v56 }
  0xe4   : > { %v464_v1 = vrot.slane %v442_v62, %v2987_v56  ;;  %v511_v7 = vrot.slane %v450_v0, %v2926_v16  ;;  %v472_v10 = vcombine.high %v450_v0, %v450_v0  ;;  %v443_v12 = vcombine.high %v441_v2, %v441_v2 }
  0xe5   : > { %v457_v22 = vrot.slane %v441_v2, %v2987_v56 }
  0xe6   : > { %360 = vbcast.lane.b32.xlu1 %v358_v38, 256  ;;  %353 = vbcast.lane.b32.xlu0 %v351_v39, 256  ;;  %v515_v8 = vrot.slane %v464_v1, %v2926_v16  ;;  %v474_v9 = vcombine.high %v464_v1, %v464_v1  ;;  %v519_v20 = vrot.slane %v472_v10, %v2926_v16 }
  0xe7   : > { %v471_v21 = vrot.slane %v443_v12, %v2987_v56  ;;  %v527_v35 = vrot.slane %v457_v22, %v2926_v16  ;;  %v401_v10 = vrot.slane %v385_v52, %v2987_v56  ;;  %v393_v12 = vcombine.high %v385_v52, %v385_v52 }
  0xe8   : > { %v523_v17 = vrot.slane %v474_v9, %v2926_v16 }
  0xe9   : > { %v531_v34 = vrot.slane %v471_v21, %v2926_v16  ;;  %v479_v33 = vrot.slane %v401_v10, %v2926_v16 }
  0xea   : > { %374 = vbcast.lane.b32.xlu1 %v372_v40, 256  ;;  %367 = vbcast.lane.b32.xlu0 %v365_v41, 256  ;;  %v473_v41 = vcombine.high %v457_v22, %v457_v22 }
  0xec   : > { %v535_v59 = vrot.slane %v473_v41, %v2926_v16 }
  0xee   : > { %283 = vbcast.lane.b32.xlu1 %v281_v43, 256  ;;  %269 = vbcast.lane.b32.xlu0 %v267_v44, 256 }
  0xf2   : > { %290 = vbcast.lane.b32.xlu1 %v288_v45, 256  ;;  %276 = vbcast.lane.b32.xlu0 %v274_v46, 256 }
  0xf6   : > { %304 = vbcast.lane.b32.xlu1 %v302_v47, 256  ;;  %297 = vbcast.lane.b32.xlu0 %v295_v48, 256  ;;  %v475_v48 = vcombine.high %v471_v21, %v471_v21 }
  0xfa   : > { %318 = vbcast.lane.b32.xlu1 %v316_v49, 256  ;;  %311 = vbcast.lane.b32.xlu0 %v309_v50, 256 }
 0x10a   : > { %v2982_v53 = vpop.permute.xlu1 %1034  ;;  %v2984_v54 = vpop.permute.xlu0 %1027 }
 0x10e   : > { %v2989_v57 = vpop.permute.xlu1 %1041  ;;  %v2991_v58 = vpop.permute.xlu0 %1048 }
 0x112   : > { %v2994_v60 = vpop.permute.xlu1 %1055  ;;  %v2996_v61 = vpop.permute.xlu0 %1062 }
 0x116   : > { %v3001_v3 = vpop.permute.xlu1 %1069  ;;  %v3003_v4 = vpop.permute.xlu0 %1076 }
 0x150   : > { %v333_v13 = vpop.permute.xlu1 %332  ;;  %v326_v14 = vpop.permute.xlu0 %325 }
 0x151   : > { %vm565_vm3 = vcmp.gt.f32.partialorder %v515_v8, %v333_v13  ;;  %vm581_vm4 = vcmp.eq.f32.partialorder %v515_v8, %v333_v13  ;;  %vm580_vm5 = vcmp.eq.f32.partialorder %v511_v7, %v326_v14  ;;  %vm564_vm7 = vcmp.gt.f32.partialorder %v511_v7, %v326_v14 }
 0x152   : > { %vm598_vm6 = vmand %vm581_vm4, %vm3007_vm2  ;;  %v539_v8 = vrot.slane %v475_v48, %v2926_v16 }
 0x153   : > { %vm614_vm9 = vmor %vm565_vm3, %vm598_vm6 }
 0x154   : > { %vm597_vm10 = vmand %vm580_vm5, %vm3007_vm2  ;;  %v347_v23 = vpop.permute.xlu1 %346  ;;  %v340_v26 = vpop.permute.xlu0 %339  ;;  %v630_v27 = vsel %vm614_vm9, 1, %v2835_v32 }
 0x155   : > { %vm613_vm11 = vmor %vm564_vm7, %vm597_vm10  ;;  %vm567_vm12 = vcmp.gt.f32.partialorder %v523_v17, %v347_v23  ;;  %vm583_vm13 = vcmp.eq.f32.partialorder %v523_v17, %v347_v23  ;;  %vm582_vm14 = vcmp.eq.f32.partialorder %v519_v20, %v340_v26  ;;  %vm566_vm0 = vcmp.gt.f32.partialorder %v519_v20, %v340_v26 }
 0x156   : > { %vm600_vm15 = vmand %vm583_vm13, %vm3007_vm2  ;;  %v629_v30 = vsel %vm613_vm11, 1, %v2835_v32  ;;  %v755_v31 = vsel %vm637_vm8, %v630_v27, 0  ;;  %v378_v23 = vcombine.high %v2964_v42, %v2964_v42 }
 0x157   : > { %vm3026_vm1 = vmor %vm567_vm12, %vm600_vm15  ;;  %v742_v36 = vsel %vm637_vm8, %v629_v30, 0  ;;  %v756_v43 = vand.u32 65535, %v755_v31  ;;  %v757_v46 = vshrl.u32 %v755_v31, 16  ;;  %v423_v31 = vcombine.high %v401_v10, %v401_v10 }
 0x158   : > { %vm599_vm3 = vmand %vm582_vm14, %vm3007_vm2  ;;  %v361_v37 = vpop.permute.xlu1 %360  ;;  %v354_v38 = vpop.permute.xlu0 %353  ;;  %v743_v39 = vand.u32 65535, %v742_v36  ;;  %v744_v40 = vshrl.u32 %v742_v36, 16  ;;  %v632_v50 = vsel %vm3026_vm1, 1, %v2835_v32 }
 0x159   : > { %vm615_vm4 = vmor %vm566_vm0, %vm599_vm3  ;;  %vm585_vm5 = vcmp.eq.f32.partialorder %v531_v34, %v361_v37  ;;  %vm584_vm6 = vcmp.eq.f32.partialorder %v527_v35, %v354_v38  ;;  %vm568_vm7 = vcmp.gt.f32.partialorder %v527_v35, %v354_v38  ;;  %vm569_vm11 = vcmp.gt.f32.partialorder %v531_v34, %v361_v37 }
 0x15a   : > { %v745_v44 = vcvt.s32.f32 %v743_v39  ;;  %v746_v45 = vcvt.s32.f32 %v744_v40  ;;  %vm3037_vm9 = vmand %vm585_vm5, %vm3007_vm2  ;;  %v631_v49 = vsel %vm615_vm4, 1, %v2835_v32  ;;  %v758_v62 = vcvt.s32.f32 %v756_v43 }
 0x15b   : > { %vm601_vm10 = vmand %vm584_vm6, %vm3007_vm2  ;;  %v768_v55 = vsel %vm637_vm8, %v631_v49, 0  ;;  %v759_v0 = vcvt.s32.f32 %v757_v46  ;;  %v781_v7 = vsel %vm637_vm8, %v632_v50, 0  ;;  %v415_v34 = vrot.slane %v393_v12, %v2987_v56 }
 0x15c   : > { %747 = vadd.xlane.f32.xlu1 %v745_v44  ;;  %749 = vadd.xlane.f32.xlu0 %v746_v45  ;;  %v368_v51 = vpop.permute.xlu0 %367  ;;  %vm617_vm12 = vmor %vm568_vm7, %vm601_vm10  ;;  %v375_v63 = vpop.permute.xlu1 %374  ;;  %v769_v1 = vand.u32 65535, %v768_v55  ;;  %v770_v2 = vshrl.u32 %v768_v55, 16  ;;  %v782_v14 = vand.u32 65535, %v781_v7  ;;  %v783_v17 = vshrl.u32 %v781_v7, 16 }
 0x15d   : > { %vm586_vm13 = vcmp.eq.f32.partialorder %v535_v59, %v368_v51  ;;  %vm3056_vm14 = vmor %vm569_vm11, %vm3037_vm9  ;;  %v633_v13 = vsel %vm617_vm12, 1, %v2835_v32  ;;  %vm587_vm15 = vcmp.eq.f32.partialorder %v539_v8, %v375_v63  ;;  %vm570_vm0 = vcmp.gt.f32.partialorder %v535_v59, %v368_v51 }
 0x15e   : > { %vm603_vm1 = vmand %vm586_vm13, %vm3007_vm2  ;;  %v771_v21 = vcvt.s32.f32 %v769_v1  ;;  %v772_v22 = vcvt.s32.f32 %v770_v2  ;;  %v794_v26 = vsel %vm637_vm8, %v633_v13, 0  ;;  %v634_v27 = vsel %vm3056_vm14, 1, %v2835_v32 }
 0x15f   : > { %vm3072_vm3 = vmand %vm587_vm15, %vm3007_vm2  ;;  %vm571_vm4 = vcmp.gt.f32.partialorder %v539_v8, %v375_v63  ;;  %v784_v42 = vcvt.s32.f32 %v782_v14  ;;  %v785_v35 = vcvt.s32.f32 %v783_v17  ;;  %v795_v37 = vand.u32 65535, %v794_v26 }
 0x160   : > { %760 = vadd.xlane.f32.xlu1 %v758_v62  ;;  %762 = vadd.xlane.f32.xlu0 %v759_v0  ;;  %v270_v20 = vpop.permute.xlu0 %269  ;;  %vm619_vm5 = vmor %vm570_vm0, %vm603_vm1  ;;  %v284_v36 = vpop.permute.xlu1 %283  ;;  %v796_v38 = vshrl.u32 %v794_v26, 16  ;;  %v807_v39 = vsel %vm637_vm8, %v634_v27, 0  ;;  %v487_v41 = vrot.slane %v423_v31, %v2926_v16  ;;  %v425_v43 = vcombine.high %v415_v34, %v415_v34 }
 0x161   : > { %vm572_vm6 = vcmp.eq.f32.partialorder %v479_v33, %v270_v20  ;;  %vm3082_vm7 = vmor %vm571_vm4, %vm3072_vm3  ;;  %v392_v45 = vrot.slane %v378_v23, %v2987_v56  ;;  %v635_v46 = vsel %vm619_vm5, 1, %v2835_v32  ;;  %vm556_vm9 = vcmp.gt.f32.partialorder %v479_v33, %v270_v20 }
 0x162   : > { %vm589_vm10 = vmand %vm572_vm6, %vm3007_vm2  ;;  %v483_v47 = vrot.slane %v415_v34, %v2926_v16  ;;  %v808_v48 = vand.u32 65535, %v807_v39  ;;  %v809_v49 = vshrl.u32 %v807_v39, 16  ;;  %vm574_vm11 = vcmp.eq.f32.partialorder %v487_v41, %v284_v36 }
 0x163   : > { %v797_v50 = vcvt.s32.f32 %v795_v37  ;;  %v798_v51 = vcvt.s32.f32 %v796_v38  ;;  %v820_v52 = vsel %vm637_vm8, %v635_v46, 0  ;;  %v636_v55 = vsel %vm3082_vm7, 1, %v2835_v32  ;;  %vm3096_vm13 = vmor %vm556_vm9, %vm589_vm10 }
 0x164   : > { %773 = vadd.xlane.f32.xlu1 %v771_v21  ;;  %775 = vadd.xlane.f32.xlu0 %v772_v22  ;;  %v277_v44 = vpop.permute.xlu0 %276  ;;  %v291_v62 = vpop.permute.xlu1 %290  ;;  %v394_v63 = vcombine.high %v392_v45, %v392_v45  ;;  %v408_v0 = vrot.slane %v392_v45, %v2987_v56  ;;  %vm558_vm14 = vcmp.gt.f32.partialorder %v487_v41, %v284_v36  ;;  %vm591_vm15 = vmand %vm574_vm11, %vm3007_vm2  ;;  %v810_v2 = vcvt.s32.f32 %v808_v48 }
 0x165   : > { %vm573_vm12 = vcmp.eq.f32.partialorder %v483_v47, %v277_v44  ;;  %v491_v1 = vrot.slane %v425_v43, %v2926_v16  ;;  %v811_v7 = vcvt.s32.f32 %v809_v49  ;;  %vm557_vm0 = vcmp.gt.f32.partialorder %v483_v47, %v277_v44  ;;  %vm3111_vm4 = vmor %vm558_vm14, %vm591_vm15 }
 0x166   : > { %vm590_vm1 = vmand %vm573_vm12, %vm3007_vm2  ;;  %v821_v8 = vand.u32 65535, %v820_v52  ;;  %v822_v9 = vshrl.u32 %v820_v52, 16  ;;  %v833_v10 = vsel %vm637_vm8, %v636_v55, 0  ;;  %v621_v12 = vsel %vm3096_vm13, 1, %v2835_v32 }
 0x167   : > { %vm575_vm3 = vcmp.eq.f32.partialorder %v491_v1, %v291_v62  ;;  %vm559_vm5 = vcmp.gt.f32.partialorder %v491_v1, %v291_v62  ;;  %vm606_vm6 = vmor %vm557_vm0, %vm590_vm1  ;;  %v422_v17 = vrot.slane %v394_v63, %v2987_v56  ;;  %v495_v20 = vrot.slane %v408_v0, %v2926_v16 }
 0x168   : > { %786 = vadd.xlane.f32.xlu1 %v784_v42  ;;  %788 = vadd.xlane.f32.xlu0 %v785_v35  ;;  %v298_v14 = vpop.permute.xlu0 %297  ;;  %v834_v21 = vand.u32 65535, %v833_v10  ;;  %vm592_vm7 = vmand %vm575_vm3, %vm3007_vm2  ;;  %v823_v22 = vcvt.s32.f32 %v821_v8  ;;  %v824_v23 = vcvt.s32.f32 %v822_v9  ;;  %v835_v26 = vshrl.u32 %v833_v10, 16  ;;  %v305_v30 = vpop.permute.xlu1 %304 }
 0x169   : > { %v638_v27 = vsel %vm637_vm8, %v621_v12, 0  ;;  %vm576_vm9 = vcmp.eq.f32.partialorder %v495_v20, %v298_v14  ;;  %v623_v31 = vsel %vm3111_vm4, 1, %v2835_v32  ;;  %v622_v56 = vsel %vm606_vm6, 1, %v2835_v32  ;;  %vm608_vm10 = vmor %vm559_vm5, %vm592_vm7 }
 0x16a   : > { %v499_v33 = vrot.slane %v422_v17, %v2926_v16  ;;  %v424_v34 = vcombine.high %v408_v0, %v408_v0  ;;  %v640_v42 = vshrl.u32 %v638_v27, 16  ;;  %vm560_vm11 = vcmp.gt.f32.partialorder %v495_v20, %v298_v14  ;;  %vm593_vm12 = vmand %vm576_vm9, %vm3007_vm2 }
 0x16b   : > { %v836_v35 = vcvt.s32.f32 %v834_v21  ;;  %v837_v36 = vcvt.s32.f32 %v835_v26  ;;  %v639_v37 = vand.u32 65535, %v638_v27  ;;  %v664_v38 = vsel %vm637_vm8, %v623_v31, 0  ;;  %vm609_vm15 = vmor %vm560_vm11, %vm593_vm12 }
 0x16c   : > { %799 = vadd.xlane.f32.xlu1 %v797_v50  ;;  %801 = vadd.xlane.f32.xlu0 %v798_v51  ;;  %vm577_vm13 = vcmp.eq.f32.partialorder %v499_v33, %v305_v30  ;;  %v651_v39 = vsel %vm637_vm8, %v622_v56, 0  ;;  %v312_v40 = vpop.permute.xlu0 %311  ;;  %v624_v41 = vsel %vm608_vm10, 1, %v2835_v32  ;;  %vm561_vm14 = vcmp.gt.f32.partialorder %v499_v33, %v305_v30  ;;  %v319_v50 = vpop.permute.xlu1 %318 }
 0x16d   : > { %v426_v43 = vcombine.high %v422_v17, %v422_v17  ;;  %v503_v44 = vrot.slane %v424_v34, %v2926_v16  ;;  %vm594_vm0 = vmand %vm577_vm13, %vm3007_vm2  ;;  %v642_v45 = vcvt.s32.f32 %v640_v42  ;;  %v641_v46 = vcvt.s32.f32 %v639_v37 }
 0x16e   : > { %v665_v47 = vand.u32 65535, %v664_v38  ;;  %v652_v48 = vand.u32 65535, %v651_v39  ;;  %v677_v49 = vsel %vm637_vm8, %v624_v41, 0  ;;  %v625_v51 = vsel %vm609_vm15, 1, %v2835_v32  ;;  %vm610_vm3 = vmor %vm561_vm14, %vm594_vm0 }
 0x16f   : > { %vm578_vm1 = vcmp.eq.f32.partialorder %v503_v44, %v312_v40  ;;  %v507_v52 = vrot.slane %v426_v43, %v2926_v16  ;;  %vm562_vm4 = vcmp.gt.f32.partialorder %v503_v44, %v312_v40  ;;  %v678_v62 = vand.u32 65535, %v677_v49 }
 0x170   : > { %812 = vadd.xlane.f32.xlu1 %v810_v2  ;;  %814 = vadd.xlane.f32.xlu0 %v811_v7  ;;  %vm595_vm5 = vmand %vm578_vm1, %vm3007_vm2  ;;  %v667_v55 = vcvt.s32.f32 %v665_v47  ;;  %v654_v59 = vcvt.s32.f32 %v652_v48  ;;  %v653_v63 = vshrl.u32 %v651_v39, 16  ;;  %v690_v0 = vsel %vm637_vm8, %v625_v51, 0 }
 0x171   : > { %vm579_vm6 = vcmp.eq.f32.partialorder %v507_v52, %v319_v50  ;;  %v626_v1 = vsel %vm610_vm3, 1, %v2835_v32  ;;  %vm611_vm7 = vmor %vm562_vm4, %vm595_vm5  ;;  %v666_v2 = vshrl.u32 %v664_v38, 16  ;;  %vm563_vm9 = vcmp.gt.f32.partialorder %v507_v52, %v319_v50 }
 0x172   : > { %vm596_vm10 = vmand %vm579_vm6, %vm3007_vm2  ;;  %v680_v7 = vcvt.s32.f32 %v678_v62  ;;  %v655_v8 = vcvt.s32.f32 %v653_v63  ;;  %v691_v9 = vand.u32 65535, %v690_v0  ;;  %v703_v10 = vsel %vm637_vm8, %v626_v1, 0 }
 0x173   : > { %v627_v12 = vsel %vm611_vm7, 1, %v2835_v32  ;;  %vm612_vm11 = vmor %vm563_vm9, %vm596_vm10  ;;  %v668_v13 = vcvt.s32.f32 %v666_v2  ;;  %v679_v17 = vshrl.u32 %v677_v49, 16  ;;  %v704_v20 = vand.u32 65535, %v703_v10 }
 0x174   : > { %825 = vadd.xlane.f32.xlu1 %v823_v22  ;;  %827 = vadd.xlane.f32.xlu0 %v824_v23  ;;  %v693_v14 = vcvt.s32.f32 %v691_v9  ;;  %v716_v21 = vsel %vm637_vm8, %v627_v12, 0  ;;  %v628_v6 = vsel %vm612_vm11, 1, %v2835_v32  ;;  %v692_v26 = vshrl.u32 %v690_v0, 16 }
 0x175   : > { %v681_v22 = vcvt.s32.f32 %v679_v17  ;;  %v706_v23 = vcvt.s32.f32 %v704_v20  ;;  %v717_v27 = vand.u32 65535, %v716_v21  ;;  %v729_v30 = vsel %vm637_vm8, %v628_v6, 0 }
 0x176   : > { %v694_v31 = vcvt.s32.f32 %v692_v26  ;;  %v705_v33 = vshrl.u32 %v703_v10, 16  ;;  %v730_v34 = vand.u32 65535, %v729_v30  ;;  %v731_v37 = vshrl.u32 %v729_v30, 16 }
 0x177   : > { %v719_v56 = vcvt.s32.f32 %v717_v27  ;;  %v3150_v39 = vstv %s2696_s6  ;;  %v3163_v49 = vrot.slane %v2920_v11, %v2926_v16  ;;  %v3167_v50 = vrot.slane %v2920_v11, %v2929_v18 }
 0x178   : > { %838 = vadd.xlane.f32.xlu1 %v836_v35  ;;  %840 = vadd.xlane.f32.xlu0 %v837_v36  ;;  %v707_v42 = vcvt.s32.f32 %v705_v33  ;;  %v732_v35 = vcvt.s32.f32 %v730_v34  ;;  %v718_v36 = vshrl.u32 %v716_v21, 16  ;;  %v733_v38 = vcvt.s32.f32 %v731_v37 }
 0x179   : > { %v1223_v40 = vadd.s32 8, %v3150_v39  ;;  %v3179_v16 = vrot.slane %v2920_v11, %v2939_v24  ;;  %v3187_v2 = vrot.slane %v2920_v11, %v2950_v29 }
 0x17a   : > { %v720_v32 = vcvt.s32.f32 %v718_v36  ;;  %v1225_v36 = vadd.s32 10, %v3150_v39 }
 0x17b   : > { %vm1239_vm2 = vcmp.lt.s32.totalorder %v1223_v40, 40 }
 0x17c   : > { %645 = vadd.xlane.f32.xlu1 %v642_v45  ;;  %643 = vadd.xlane.f32.xlu0 %v641_v46  ;;  %v3155_v45 = vrot.slane %v2920_v11, %v2923_v15  ;;  %v3159_v46 = vrot.slane %v2920_v11, %v2932_v19  ;;  %v3171_v15 = vrot.slane %v2920_v11, %v2942_v25 }
 0x180   : > { %669 = vadd.xlane.f32.xlu1 %v667_v55  ;;  %656 = vadd.xlane.f32.xlu0 %v654_v59  ;;  %v4319_v55 = vmov 0.0  }
 0x181   : > { %v2705_v19 = vsel %vm1239_vm2, 1.0, %v4319_v55  ;;  %vm1241_vm2 = vcmp.lt.s32.totalorder %v1225_v36, 40 }
 0x184   : > { %682 = vadd.xlane.f32.xlu1 %v680_v7  ;;  %658 = vadd.xlane.f32.xlu0 %v655_v8  ;;  %v3193_v8 = vrot.slane %v2920_v11, %v2947_v28 }
 0x188   : > { %671 = vadd.xlane.f32.xlu0 %v668_v13  ;;  %695 = vadd.xlane.f32.xlu1 %v693_v14  ;;  %v1224_v14 = vadd.s32 9, %v3150_v39 }
 0x18a   : > { %vm1240_vm6 = vcmp.lt.s32.totalorder %v1224_v14, 40 }
 0x18b   : > { %v3211_v34 = vsel %vm1240_vm6, 1.0, %v4319_v55 }
 0x18c   : > { %684 = vadd.xlane.f32.xlu0 %v681_v22  ;;  %708 = vadd.xlane.f32.xlu1 %v706_v23 }
 0x190   : > { %697 = vadd.xlane.f32.xlu0 %v694_v31  ;;  %721 = vadd.xlane.f32.xlu1 %v719_v56 }
 0x194   : > { %710 = vadd.xlane.f32.xlu0 %v707_v42  ;;  %734 = vadd.xlane.f32.xlu1 %v732_v35 }
 0x198   : > { %723 = vadd.xlane.f32.xlu0 %v720_v32 }
 0x19c   : > { %736 = vadd.xlane.f32.xlu0 %v733_v38 }
 0x1e5   : > { %v748_v41 = vpop.xlane.xlu1 %747  ;;  %v750_v43 = vpop.xlane.xlu0 %749 }
 0x1e6   : > { %v752_v44 = vcvt.f32.s32 %v750_v43  ;;  %v751_v47 = vcvt.f32.s32 %v748_v41 }
 0x1e8   : > { %v753_v48 = vshll.u32 %v752_v44, 16 }
 0x1e9   : > { %v763_v51 = vpop.xlane.xlu0 %762  ;;  %v761_v63 = vpop.xlane.xlu1 %760 }
 0x1ea   : > { %v754_v52 = vadd.s32 %v753_v48, %v751_v47  ;;  %v765_v59 = vcvt.f32.s32 %v763_v51  ;;  %v764_v10 = vcvt.f32.s32 %v761_v63 }
 0x1ec   : > { %vm958_vm12 = vcmp.eq.s32.totalorder %v754_v52, %v3155_v45  ;;  %vm957_vm13 = vcmp.eq.s32.totalorder %v754_v52, %v3163_v49  ;;  %vm960_vm14 = vcmp.eq.s32.totalorder %v754_v52, %v3159_v46  ;;  %vm959_vm15 = vcmp.eq.s32.totalorder %v754_v52, %v3167_v50 }
 0x1ed   : > { %v1151_v18 = vsel %vm958_vm12, %v2982_v53, 0.0  ;;  %v1150_v62 = vsel %vm957_vm13, %v2984_v54, 0.0  ;;  %v1153_v1 = vsel %vm960_vm14, %v2991_v58, 0.0  ;;  %v766_v7 = vshll.u32 %v765_v59, 16  ;;  %v776_v9 = vpop.xlane.xlu0 %775  ;;  %v774_v6 = vpop.xlane.xlu1 %773 }
 0x1ee   : > { %v1344_v25 = vmul.f32 %v2705_v19, %v1151_v18  ;;  %v1343_v0 = vmul.f32 %v2705_v19, %v1150_v62  ;;  %v1152_v24 = vsel %vm959_vm15, %v2989_v57, 0.0  ;;  %vm962_vm0 = vcmp.eq.s32.totalorder %v754_v52, %v3171_v15 }
 0x1ef   : > { %vm961_vm1 = vcmp.eq.s32.totalorder %v754_v52, %v3179_v16  ;;  %v1346_v12 = vmul.f32 %v2705_v19, %v1153_v1  ;;  %v1345_v13 = vmul.f32 %v2705_v19, %v1152_v24  ;;  %v1155_v29 = vsel %vm962_vm0, %v2996_v61, 0.0 }
 0x1f0   : > { %1731 = vperm.xlu1 %2771, %v1344_v25   ;;  %1728 = vperm.xlu0 %2770, %v1343_v0   ;;  %v3198_v17 = vadd.s32 %v766_v7, %v764_v10  ;;  %v778_v20 = vcvt.f32.s32 %v776_v9  ;;  %v1154_v21 = vsel %vm961_vm1, %v2994_v60, 0.0  ;;  %vm964_vm3 = vcmp.eq.s32.totalorder %v754_v52, %v3187_v2 }
 0x1f1   : > { %vm963_vm4 = vcmp.eq.s32.totalorder %v754_v52, %v3193_v8  ;;  %v1348_v28 = vmul.f32 %v2705_v19, %v1155_v29  ;;  %v1347_v22 = vmul.f32 %v2705_v19, %v1154_v21  ;;  %v1157_v23 = vsel %vm964_vm3, %v3003_v4, 0.0  ;;  %v789_v32 = vpop.xlane.xlu0 %788  ;;  %v787_v47 = vpop.xlane.xlu1 %786 }
 0x1f2   : > { %v779_v26 = vshll.u32 %v778_v20, 16  ;;  %v1156_v27 = vsel %vm963_vm4, %v3001_v3, 0.0  ;;  %vm966_vm5 = vcmp.eq.s32.totalorder %v3198_v17, %v3155_v45  ;;  %vm965_vm7 = vcmp.eq.s32.totalorder %v3198_v17, %v3163_v49 }
 0x1f3   : > { %v777_v30 = vcvt.f32.s32 %v774_v6  ;;  %v1350_v31 = vmul.f32 %v2705_v19, %v1157_v23  ;;  %v1349_v56 = vmul.f32 %v2705_v19, %v1156_v27  ;;  %v1159_v33 = vsel %vm966_vm5, %v2982_v53, 0.0 }
 0x1f4   : > { %1737 = vperm.xlu1 %2771, %v1346_v12   ;;  %1734 = vperm.xlu0 %2770, %v1345_v13   ;;  %v1158_v35 = vsel %vm965_vm7, %v2984_v54, 0.0  ;;  %vm968_vm9 = vcmp.eq.s32.totalorder %v3198_v17, %v3159_v46  ;;  %vm967_vm10 = vcmp.eq.s32.totalorder %v3198_v17, %v3167_v50  ;;  %v1352_v37 = vmul.f32 %v3211_v34, %v1159_v33 }
 0x1f5   : > { %v3213_v42 = vadd.s32 %v779_v26, %v777_v30  ;;  %v1351_v38 = vmul.f32 %v3211_v34, %v1158_v35  ;;  %v1161_v40 = vsel %vm968_vm9, %v2991_v58, 0.0  ;;  %v791_v41 = vcvt.f32.s32 %v789_v32  ;;  %v802_v13 = vpop.xlane.xlu0 %801  ;;  %v800_v23 = vpop.xlane.xlu1 %799 }
 0x1f6   : > { %v1160_v43 = vsel %vm967_vm10, %v2989_v57, 0.0  ;;  %vm969_vm12 = vcmp.eq.s32.totalorder %v3198_v17, %v3179_v16  ;;  %v1354_v44 = vmul.f32 %v3211_v34, %v1161_v40  ;;  %v3233_v52 = vsel %vm1241_vm2, 1.0, %v4319_v55 }
 0x1f7   : > { %vm973_vm11 = vcmp.eq.s32.totalorder %v3213_v42, %v3163_v49  ;;  %v1353_v48 = vmul.f32 %v3211_v34, %v1160_v43  ;;  %v792_v19 = vshll.u32 %v791_v41, 16  ;;  %v1162_v59 = vsel %vm969_vm12, %v2994_v60, 0.0 }
 0x1f8   : > { %1743 = vperm.xlu1 %2771, %v1348_v28   ;;  %1740 = vperm.xlu0 %2770, %v1347_v22   ;;  %v1166_v51 = vsel %vm973_vm11, %v2984_v54, 0.0  ;;  %vm975_vm13 = vcmp.eq.s32.totalorder %v3213_v42, %v3167_v50  ;;  %vm974_vm14 = vcmp.eq.s32.totalorder %v3213_v42, %v3155_v45  ;;  %v790_v18 = vcvt.f32.s32 %v787_v47 }
 0x1f9   : > { %v1359_v62 = vmul.f32 %v3233_v52, %v1166_v51  ;;  %v1355_v25 = vmul.f32 %v3211_v34, %v1162_v59  ;;  %v1168_v63 = vsel %vm975_vm13, %v2989_v57, 0.0  ;;  %v1167_v1 = vsel %vm974_vm14, %v2982_v53, 0.0 }
 0x1fa   : > { %v3243_v0 = vadd.s32 %v792_v19, %v790_v18  ;;  %vm976_vm15 = vcmp.eq.s32.totalorder %v3213_v42, %v3159_v46  ;;  %v1226_v7 = vadd.s32 11, %v3150_v39  ;;  %vm970_vm0 = vcmp.eq.s32.totalorder %v3198_v17, %v3171_v15 }
 0x1fb   : > { %v1361_v24 = vmul.f32 %v3233_v52, %v1168_v63  ;;  %v1360_v9 = vmul.f32 %v3233_v52, %v1167_v1  ;;  %v1169_v10 = vsel %vm976_vm15, %v2991_v58, 0.0  ;;  %v1163_v12 = vsel %vm970_vm0, %v2996_v61, 0.0 }
 0x1fc   : > { %1749 = vperm.xlu1 %2771, %v1350_v31   ;;  %1746 = vperm.xlu0 %2770, %v1349_v56   ;;  %vm982_vm1 = vcmp.eq.s32.totalorder %v3243_v0, %v3155_v45  ;;  %vm1242_vm3 = vcmp.lt.s32.totalorder %v1226_v7, 40  ;;  %vm981_vm4 = vcmp.eq.s32.totalorder %v3243_v0, %v3163_v49  ;;  %v1362_v29 = vmul.f32 %v3233_v52, %v1169_v10 }
 0x1fd   : > { %v1356_v14 = vmul.f32 %v3211_v34, %v1163_v12  ;;  %v1175_v20 = vsel %vm982_vm1, %v2982_v53, 0.0  ;;  %v3263_v21 = vsel %vm1242_vm3, 1.0, %v4319_v55  ;;  %v804_v28 = vcvt.f32.s32 %v802_v13 }
 0x1fe   : > { %v1174_v6 = vsel %vm981_vm4, %v2984_v54, 0.0  ;;  %vm977_vm5 = vcmp.eq.s32.totalorder %v3213_v42, %v3179_v16  ;;  %vm971_vm6 = vcmp.eq.s32.totalorder %v3198_v17, %v3193_v8  ;;  %v1368_v22 = vmul.f32 %v3263_v21, %v1175_v20 }
 0x1ff   : > { %v1367_v26 = vmul.f32 %v3263_v21, %v1174_v6  ;;  %v1170_v27 = vsel %vm977_vm5, %v2994_v60, 0.0  ;;  %v805_v30 = vshll.u32 %v804_v28, 16  ;;  %v1164_v31 = vsel %vm971_vm6, %v3001_v3, 0.0 }
 0x200   : > { %1755 = vperm.xlu1 %2771, %v1352_v37   ;;  %1752 = vperm.xlu0 %2770, %v1351_v38   ;;  %vm972_vm7 = vcmp.eq.s32.totalorder %v3198_v17, %v3187_v2  ;;  %vm983_vm9 = vcmp.eq.s32.totalorder %v3243_v0, %v3167_v50  ;;  %v803_v56 = vcvt.f32.s32 %v800_v23  ;;  %v1363_v33 = vmul.f32 %v3233_v52, %v1170_v27 }
 0x201   : > { %v1357_v35 = vmul.f32 %v3211_v34, %v1164_v31  ;;  %v1165_v36 = vsel %vm972_vm7, %v3003_v4, 0.0  ;;  %v1176_v37 = vsel %vm983_vm9, %v2989_v57, 0.0  ;;  %vm984_vm10 = vcmp.eq.s32.totalorder %v3243_v0, %v3159_v46 }
 0x202   : > { %v3281_v32 = vadd.s32 %v805_v30, %v803_v56  ;;  %v1227_v17 = vadd.s32 12, %v3150_v39  ;;  %vm978_vm11 = vcmp.eq.s32.totalorder %v3213_v42, %v3171_v15  ;;  %v1358_v38 = vmul.f32 %v3211_v34, %v1165_v36 }
 0x203   : > { %v1369_v40 = vmul.f32 %v3263_v21, %v1176_v37  ;;  %v1177_v41 = vsel %vm984_vm10, %v2991_v58, 0.0  ;;  %v1171_v43 = vsel %vm978_vm11, %v2996_v61, 0.0  ;;  %vm985_vm14 = vcmp.eq.s32.totalorder %v3243_v0, %v3179_v16 }
 0x204   : > { %1761 = vperm.xlu1 %2771, %v1354_v44   ;;  %1758 = vperm.xlu0 %2770, %v1353_v48   ;;  %vm990_vm2 = vcmp.eq.s32.totalorder %v3281_v32, %v3155_v45  ;;  %vm1243_vm12 = vcmp.lt.s32.totalorder %v1227_v17, 40  ;;  %v815_v44 = vpop.xlane.xlu0 %814  ;;  %vm989_vm13 = vcmp.eq.s32.totalorder %v3281_v32, %v3163_v49  ;;  %v1370_v47 = vmul.f32 %v3263_v21, %v1177_v41 }
 0x205   : > { %v1364_v34 = vmul.f32 %v3233_v52, %v1171_v43  ;;  %v1183_v48 = vsel %vm990_vm2, %v2982_v53, 0.0  ;;  %v3301_v51 = vsel %vm1243_vm12, 1.0, %v4319_v55  ;;  %v817_v19 = vcvt.f32.s32 %v815_v44 }
 0x206   : > { %v1182_v59 = vsel %vm989_vm13, %v2984_v54, 0.0  ;;  %vm979_vm15 = vcmp.eq.s32.totalorder %v3213_v42, %v3193_v8  ;;  %v1376_v18 = vmul.f32 %v3301_v51, %v1183_v48  ;;  %v1178_v63 = vsel %vm985_vm14, %v2994_v60, 0.0 }
 0x207   : > { %v818_v1 = vshll.u32 %v817_v19, 16  ;;  %v1172_v7 = vsel %vm979_vm15, %v3001_v3, 0.0  ;;  %vm980_vm0 = vcmp.eq.s32.totalorder %v3213_v42, %v3187_v2  ;;  %vm991_vm1 = vcmp.eq.s32.totalorder %v3281_v32, %v3167_v50 }
 0x208   : > { %1776 = vperm.xlu1 %2771, %v1359_v62   ;;  %1764 = vperm.xlu0 %2770, %v1355_v25   ;;  %v813_v62 = vpop.xlane.xlu1 %812  ;;  %v1375_v25 = vmul.f32 %v3301_v51, %v1182_v59  ;;  %v1365_v10 = vmul.f32 %v3233_v52, %v1172_v7  ;;  %v1173_v12 = vsel %vm980_vm0, %v3003_v4, 0.0  ;;  %vm992_vm3 = vcmp.eq.s32.totalorder %v3281_v32, %v3159_v46  ;;  %v828_v6 = vpop.xlane.xlu0 %827 }
 0x209   : > { %v1228_v42 = vadd.s32 13, %v3150_v39  ;;  %vm986_vm4 = vcmp.eq.s32.totalorder %v3243_v0, %v3171_v15  ;;  %v1185_v28 = vsel %vm992_vm3, %v2991_v58, 0.0  ;;  %v830_v30 = vcvt.f32.s32 %v828_v6 }
 0x20a   : > { %v1378_v23 = vmul.f32 %v3301_v51, %v1185_v28  ;;  %vm993_vm9 = vcmp.eq.s32.totalorder %v3281_v32, %v3179_v16  ;;  %vm987_vm10 = vcmp.eq.s32.totalorder %v3243_v0, %v3193_v8  ;;  %vm988_vm11 = vcmp.eq.s32.totalorder %v3243_v0, %v3187_v2 }
 0x20b   : > { %vm1244_vm6 = vcmp.lt.s32.totalorder %v1228_v42, 40  ;;  %v1186_v37 = vsel %vm993_vm9, %v2994_v60, 0.0  ;;  %v831_v17 = vshll.u32 %v830_v30, 16  ;;  %v1181_v44 = vsel %vm988_vm11, %v3003_v4, 0.0 }
 0x20c   : > { %1782 = vperm.xlu1 %2771, %v1361_v24   ;;  %1779 = vperm.xlu0 %2770, %v1360_v9   ;;  %v816_v24 = vcvt.f32.s32 %v813_v62  ;;  %v1371_v9 = vmul.f32 %v3263_v21, %v1178_v63  ;;  %v3339_v27 = vsel %vm1244_vm6, 1.0, %v4319_v55  ;;  %v841_v56 = vpop.xlane.xlu0 %840  ;;  %v1379_v41 = vmul.f32 %v3301_v51, %v1186_v37 }
 0x20d   : > { %v1229_v0 = vadd.s32 14, %v3150_v39  ;;  %vm994_vm13 = vcmp.eq.s32.totalorder %v3281_v32, %v3171_v15  ;;  %v1374_v19 = vmul.f32 %v3263_v21, %v1181_v44  ;;  %vm995_vm3 = vcmp.eq.s32.totalorder %v3281_v32, %v3193_v8 }
 0x20e   : > { %v3319_v13 = vadd.s32 %v818_v1, %v816_v24  ;;  %v1187_v62 = vsel %vm994_vm13, %v2996_v61, 0.0  ;;  %v1188_v6 = vsel %vm995_vm3, %v3001_v3, 0.0 }
 0x20f   : > { %vm1245_vm15 = vcmp.lt.s32.totalorder %v1229_v0, 40  ;;  %v1380_v1 = vmul.f32 %v3301_v51, %v1187_v62 }
 0x210   : > { %1785 = vperm.xlu1 %2771, %v1362_v29   ;;  %1767 = vperm.xlu0 %2770, %v1356_v14   ;;  %v1184_v29 = vsel %vm991_vm1, %v2989_v57, 0.0  ;;  %v1366_v14 = vmul.f32 %v3233_v52, %v1173_v12  ;;  %vm998_vm5 = vcmp.eq.s32.totalorder %v3319_v13, %v3155_v45  ;;  %vm997_vm7 = vcmp.eq.s32.totalorder %v3319_v13, %v3163_v49 }
 0x211   : > { %v1377_v20 = vmul.f32 %v3301_v51, %v1184_v29  ;;  %v1190_v31 = vsel %vm997_vm7, %v2984_v54, 0.0  ;;  %vm999_vm2 = vcmp.eq.s32.totalorder %v3319_v13, %v3167_v50  ;;  %vm1000_vm12 = vcmp.eq.s32.totalorder %v3319_v13, %v3159_v46 }
 0x212   : > { %v1383_v36 = vmul.f32 %v3339_v27, %v1190_v31  ;;  %v1192_v48 = vsel %vm999_vm2, %v2989_v57, 0.0  ;;  %v3381_v24 = vsel %vm1245_vm15, 1.0, %v4319_v55  ;;  %vm1001_vm1 = vcmp.eq.s32.totalorder %v3319_v13, %v3179_v16 }
 0x213   : > { %v1385_v59 = vmul.f32 %v3339_v27, %v1192_v48  ;;  %vm1002_vm7 = vcmp.eq.s32.totalorder %v3319_v13, %v3171_v15  ;;  %vm1004_vm13 = vcmp.eq.s32.totalorder %v3319_v13, %v3187_v2  ;;  %vm1231_vm15 = vcmp.lt.s32.totalorder %v3150_v39, 40 }
 0x214   : > { %1803 = vperm.xlu1 %2771, %v1368_v22   ;;  %1800 = vperm.xlu0 %2770, %v1367_v26   ;;  %v1179_v22 = vsel %vm986_vm4, %v2996_v61, 0.0  ;;  %v1191_v26 = vsel %vm998_vm5, %v2982_v53, 0.0  ;;  %vm996_vm4 = vcmp.eq.s32.totalorder %v3281_v32, %v3187_v2  ;;  %v1230_v32 = vadd.s32 15, %v3150_v39 }
 0x215   : > { %v1372_v52 = vmul.f32 %v3263_v21, %v1179_v22 }
 0x218   : > { %1788 = vperm.xlu1 %2771, %v1363_v33   ;;  %1770 = vperm.xlu0 %2770, %v1357_v35   ;;  %v1384_v33 = vmul.f32 %v3339_v27, %v1191_v26  ;;  %v826_v35 = vpop.xlane.xlu1 %825  ;;  %v1189_v26 = vsel %vm996_vm4, %v3003_v4, 0.0 }
 0x21c   : > { %1773 = vperm.xlu1 %2771, %v1358_v38   ;;  %1806 = vperm.xlu0 %2770, %v1369_v40   ;;  %v1180_v38 = vsel %vm987_vm10, %v3001_v3, 0.0  ;;  %v829_v40 = vcvt.f32.s32 %v826_v35  ;;  %vm1246_vm10 = vcmp.lt.s32.totalorder %v1230_v32, 40 }
 0x21d   : > { %v1373_v43 = vmul.f32 %v3263_v21, %v1180_v38  ;;  %v1195_v38 = vsel %vm1002_vm7, %v2996_v61, 0.0  ;;  %v2712_v48 = vsel %vm1246_vm10, 1.0, %v4319_v55 }
 0x220   : > { %1809 = vperm.xlu1 %2771, %v1370_v47   ;;  %1791 = vperm.xlu0 %2770, %v1364_v34   ;;  %v3357_v47 = vadd.s32 %v831_v17, %v829_v40  ;;  %v3359_v34 = vpop.xlane.xlu0 %643 }
 0x221   : > { %v647_v0 = vcvt.f32.s32 %v3359_v34 }
 0x222   : > { %vm1006_vm14 = vcmp.eq.s32.totalorder %v3357_v47, %v3155_v45  ;;  %vm1005_vm0 = vcmp.eq.s32.totalorder %v3357_v47, %v3163_v49  ;;  %vm1007_vm5 = vcmp.eq.s32.totalorder %v3357_v47, %v3167_v50  ;;  %vm1008_vm6 = vcmp.eq.s32.totalorder %v3357_v47, %v3159_v46 }
 0x223   : > { %v1199_v7 = vsel %vm1006_vm14, %v2982_v53, 0.0  ;;  %v1200_v31 = vsel %vm1007_vm5, %v2989_v57, 0.0  ;;  %v1201_v17 = vsel %vm1008_vm6, %v2991_v58, 0.0  ;;  %vm1009_vm2 = vcmp.eq.s32.totalorder %v3357_v47, %v3179_v16 }
 0x224   : > { %1827 = vperm.xlu1 %2771, %v1376_v18   ;;  %1824 = vperm.xlu0 %2770, %v1375_v25   ;;  %v1193_v18 = vsel %vm1000_vm12, %v2991_v58, 0.0  ;;  %v839_v25 = vpop.xlane.xlu1 %838  ;;  %v3375_v63 = vpop.xlane.xlu0 %656  ;;  %v1392_v12 = vmul.f32 %v3381_v24, %v1199_v7  ;;  %v1393_v37 = vmul.f32 %v3381_v24, %v1200_v31  ;;  %vm1003_vm12 = vcmp.eq.s32.totalorder %v3319_v13, %v3193_v8 }
 0x225   : > { %v1386_v21 = vmul.f32 %v3339_v27, %v1193_v18  ;;  %v842_v22 = vcvt.f32.s32 %v839_v25  ;;  %v1202_v25 = vsel %vm1009_vm2, %v2994_v60, 0.0  ;;  %v1197_v7 = vsel %vm1004_vm13, %v3003_v4, 0.0 }
 0x226   : > { %v1395_v13 = vmul.f32 %v3381_v24, %v1202_v25 }
 0x228   : > { %1812 = vperm.xlu1 %2771, %v1371_v9   ;;  %1794 = vperm.xlu0 %2770, %v1365_v10   ;;  %v843_v9 = vcvt.f32.s32 %v841_v56  ;;  %v1198_v10 = vsel %vm1005_vm0, %v2984_v54, 0.0  ;;  %v646_v29 = vpop.xlane.xlu1 %645  ;;  %v3391_v28 = vpop.xlane.xlu0 %658 }
 0x229   : > { %v1391_v42 = vmul.f32 %v3381_v24, %v1198_v10 }
 0x22c   : > { %1797 = vperm.xlu1 %2771, %v1366_v14   ;;  %1830 = vperm.xlu0 %2770, %v1377_v20   ;;  %v1194_v14 = vsel %vm1001_vm1, %v2994_v60, 0.0  ;;  %v844_v20 = vshll.u32 %v843_v9, 16  ;;  %v3407_v56 = vpop.xlane.xlu1 %669  ;;  %v3411_v35 = vpop.xlane.xlu0 %671 }
 0x22e   : > { %v3401_v30 = vadd.s32 %v844_v20, %v842_v22  ;;  %v1390_v20 = vmul.f32 %v3339_v27, %v1197_v7 }
 0x230   : > { %1833 = vperm.xlu1 %2771, %v1378_v23   ;;  %1815 = vperm.xlu0 %2770, %v1372_v52   ;;  %v1387_v23 = vmul.f32 %v3339_v27, %v1194_v14  ;;  %v1381_v52 = vmul.f32 %v3301_v51, %v1188_v6  ;;  %vm1014_vm9 = vcmp.eq.s32.totalorder %v3401_v30, %v3155_v45 }
 0x231   : > { %vm1013_vm11 = vcmp.eq.s32.totalorder %v3401_v30, %v3163_v49  ;;  %v1207_v44 = vsel %vm1014_vm9, %v2982_v53, 0.0  ;;  %vm1015_vm14 = vcmp.eq.s32.totalorder %v3401_v30, %v3167_v50  ;;  %vm1016_vm1 = vcmp.eq.s32.totalorder %v3401_v30, %v3159_v46 }
 0x232   : > { %v1400_v62 = vmul.f32 %v2712_v48, %v1207_v44  ;;  %v1208_v9 = vsel %vm1015_vm14, %v2989_v57, 0.0  ;;  %v1209_v14 = vsel %vm1016_vm1, %v2991_v58, 0.0  ;;  %vm1017_vm4 = vcmp.eq.s32.totalorder %v3401_v30, %v3179_v16 }
 0x233   : > { %v1401_v6 = vmul.f32 %v2712_v48, %v1208_v9  ;;  %v3464_v22 = vmul.f32 %v2712_v48, %v1209_v14  ;;  %vm1019_vm5 = vcmp.eq.s32.totalorder %v3401_v30, %v3193_v8  ;;  %vm1018_vm6 = vcmp.eq.s32.totalorder %v3401_v30, %v3171_v15 }
 0x234   : > { %1851 = vperm.xlu1 %2771, %v1384_v33   ;;  %1848 = vperm.xlu0 %2770, %v1383_v36   ;;  %v648_v33 = vcvt.f32.s32 %v646_v29  ;;  %v1382_v36 = vmul.f32 %v3301_v51, %v1189_v26  ;;  %v1388_v51 = vmul.f32 %v3339_v27, %v1195_v38  ;;  %vm1020_vm7 = vcmp.eq.s32.totalorder %v3401_v30, %v3187_v2 }
 0x236   : > { %v649_v40 = vshll.u32 %v648_v33, 16 }
 0x238   : > { %1836 = vperm.xlu1 %2771, %v1379_v41   ;;  %1818 = vperm.xlu0 %2770, %v1373_v43   ;;  %v1394_v41 = vmul.f32 %v3381_v24, %v1201_v17  ;;  %v3422_v43 = vpop.xlane.xlu1 %682  ;;  %v3435_v18 = vadd.s32 %v649_v40, %v647_v0 }
 0x23a   : > { %vm893_vm0 = vcmp.eq.s32.totalorder %v3435_v18, %v3163_v49  ;;  %vm894_vm3 = vcmp.eq.s32.totalorder %v3435_v18, %v3155_v45  ;;  %vm895_vm9 = vcmp.eq.s32.totalorder %v3435_v18, %v3167_v50  ;;  %vm897_vm10 = vcmp.eq.s32.totalorder %v3435_v18, %v3179_v16 }
 0x23b   : > { %v1087_v17 = vsel %vm894_vm3, %v2982_v53, 0.0  ;;  %v1088_v44 = vsel %vm895_vm9, %v2989_v57, 0.0  ;;  %v1090_v0 = vsel %vm897_vm10, %v2994_v60, 0.0  ;;  %vm899_vm2 = vcmp.eq.s32.totalorder %v3435_v18, %v3193_v8 }
 0x23c   : > { %1821 = vperm.xlu1 %2771, %v1374_v19   ;;  %1854 = vperm.xlu0 %2770, %v1385_v59   ;;  %v3428_v19 = vpop.xlane.xlu0 %684  ;;  %v1206_v59 = vsel %vm1013_vm11, %v2984_v54, 0.0  ;;  %vm896_vm11 = vcmp.eq.s32.totalorder %v3435_v18, %v3159_v46  ;;  %v1092_v7 = vsel %vm899_vm2, %v3001_v3, 0.0 }
 0x23d   : > { %v1399_v34 = vmul.f32 %v2712_v48, %v1206_v59 }
 0x240   : > { %1857 = vperm.xlu1 %2771, %v1386_v21   ;;  %1839 = vperm.xlu0 %2770, %v1380_v1   ;;  %v1196_v21 = vsel %vm1003_vm12, %v3001_v3, 0.0  ;;  %v3444_v1 = vpop.xlane.xlu1 %695  ;;  %v3448_v10 = vpop.xlane.xlu0 %697  ;;  %vm898_vm12 = vcmp.eq.s32.totalorder %v3435_v18, %v3171_v15 }
 0x241   : > { %v1389_v29 = vmul.f32 %v3339_v27, %v1196_v21  ;;  %v1210_v27 = vsel %vm1017_vm4, %v2994_v60, 0.0  ;;  %v1089_v21 = vsel %vm896_vm11, %v2991_v58, 0.0 }
 0x242   : > { %v3480_v31 = vmul.f32 %v2712_v48, %v1210_v27 }
 0x244   : > { %1875 = vperm.xlu1 %2771, %v1392_v12   ;;  %1872 = vperm.xlu0 %2770, %v1391_v42   ;;  %v661_v12 = vcvt.f32.s32 %v3391_v28  ;;  %v3458_v42 = vsel %vm1231_vm15, 1.0, %v4319_v55  ;;  %v1212_v28 = vsel %vm1019_vm5, %v3001_v3, 0.0  ;;  %v3478_v26 = vpop.xlane.xlu1 %708  ;;  %vm900_vm15 = vcmp.eq.s32.totalorder %v3435_v18, %v3187_v2 }
 0x245   : > { %v3482_v32 = vmul.f32 %v2712_v48, %v1212_v28  ;;  %v1283_v25 = vmul.f32 %v3458_v42, %v1090_v0  ;;  %v1282_v9 = vmul.f32 %v3458_v42, %v1089_v21 }
 0x246   : > { %v662_v38 = vshll.u32 %v661_v12, 16  ;;  %v1285_v12 = vmul.f32 %v3458_v42, %v1092_v7 }
 0x248   : > { %1860 = vperm.xlu1 %2771, %v1387_v23   ;;  %1842 = vperm.xlu0 %2770, %v1381_v52   ;;  %v1086_v23 = vsel %vm893_vm0, %v2984_v54, 0.0  ;;  %v1211_v52 = vsel %vm1018_vm6, %v2996_v61, 0.0  ;;  %v3508_v59 = vpop.xlane.xlu1 %721 }
 0x249   : > { %v3484_v33 = vmul.f32 %v2712_v48, %v1211_v52  ;;  %v1279_v40 = vmul.f32 %v3458_v42, %v1086_v23  ;;  %v674_v23 = vcvt.f32.s32 %v3411_v35 }
 0x24b   : > { %v675_v35 = vshll.u32 %v674_v23, 16 }
 0x24c   : > { %1845 = vperm.xlu1 %2771, %v1382_v36   ;;  %1878 = vperm.xlu0 %2770, %v1393_v37   ;;  %v1213_v36 = vsel %vm1020_vm7, %v3003_v4, 0.0  ;;  %v3487_v37 = vpop.xlane.xlu0 %710 }
 0x24d   : > { %v3495_v30 = vmul.f32 %v2712_v48, %v1213_v36  ;;  %v1093_v36 = vsel %vm900_vm15, %v3003_v4, 0.0 }
 0x24e   : > { %v1286_v18 = vmul.f32 %v3458_v42, %v1093_v36 }
 0x250   : > { %1881 = vperm.xlu1 %2771, %v1394_v41   ;;  %1863 = vperm.xlu0 %2770, %v1388_v51   ;;  %v660_v41 = vcvt.f32.s32 %v3375_v63  ;;  %v1280_v51 = vmul.f32 %v3458_v42, %v1087_v17  ;;  %v1216_v63 = vadd.s32 1, %v3150_v39 }
 0x252   : > { %v3506_v48 = vadd.s32 %v662_v38, %v660_v41  ;;  %vm1232_vm14 = vcmp.lt.s32.totalorder %v1216_v63, 40 }
 0x254   : > { %1899 = vperm.xlu1 %2771, %v1400_v62   ;;  %1896 = vperm.xlu0 %2770, %v1399_v34   ;;  %v3513_v62 = vpop.xlane.xlu0 %723  ;;  %v1281_v34 = vmul.f32 %v3458_v42, %v1088_v44  ;;  %vm901_vm13 = vcmp.eq.s32.totalorder %v3506_v48, %v3163_v49  ;;  %vm903_vm0 = vcmp.eq.s32.totalorder %v3506_v48, %v3167_v50 }
 0x255   : > { %v1096_v38 = vsel %vm903_vm0, %v2989_v57, 0.0  ;;  %vm902_vm1 = vcmp.eq.s32.totalorder %v3506_v48, %v3155_v45  ;;  %vm905_vm3 = vcmp.eq.s32.totalorder %v3506_v48, %v3179_v16  ;;  %vm904_vm4 = vcmp.eq.s32.totalorder %v3506_v48, %v3159_v46 }
 0x256   : > { %v1095_v44 = vsel %vm902_vm1, %v2982_v53, 0.0  ;;  %v1098_v63 = vsel %vm905_vm3, %v2994_v60, 0.0  ;;  %vm907_vm5 = vcmp.eq.s32.totalorder %v3506_v48, %v3193_v8  ;;  %v1097_v7 = vsel %vm904_vm4, %v2991_v58, 0.0 }
 0x257   : > { %vm906_vm6 = vcmp.eq.s32.totalorder %v3506_v48, %v3171_v15  ;;  %vm908_vm10 = vcmp.eq.s32.totalorder %v3506_v48, %v3187_v2 }
 0x258   : > { %1884 = vperm.xlu1 %2771, %v1395_v13   ;;  %1866 = vperm.xlu0 %2770, %v1389_v29   ;;  %v3524_v13 = vpop.xlane.xlu1 %734  ;;  %v1091_v29 = vsel %vm898_vm12, %v2996_v61, 0.0  ;;  %v3528_v14 = vpop.xlane.xlu0 %736 }
 0x259   : > { %v1284_v27 = vmul.f32 %v3458_v42, %v1091_v29 }
 0x25c   : > { %1869 = vperm.xlu1 %2771, %v1390_v20   ;;  %1902 = vperm.xlu0 %2770, %v1401_v6   ;;  %v1094_v20 = vsel %vm901_vm13, %v2984_v54, 0.0  ;;  %v3532_v6 = vsel %vm1232_vm14, 1.0, %v4319_v55 }
 0x25d   : > { %v1287_v52 = vmul.f32 %v3532_v6, %v1094_v20  ;;  %v1288_v42 = vmul.f32 %v3532_v6, %v1095_v44  ;;  %v1291_v21 = vmul.f32 %v3532_v6, %v1098_v63  ;;  %v1290_v29 = vmul.f32 %v3532_v6, %v1097_v7 }
 0x25e   : > { %v1101_v44 = vsel %vm908_vm10, %v3003_v4, 0.0 }
 0x25f   : > { %v1294_v48 = vmul.f32 %v3532_v6, %v1101_v44 }
 0x260   : > { %1536 = vperm.xlu1 %2771, %v1279_v40   ;;  %1539 = vperm.xlu0 %2770, %v1280_v51   ;;  %v673_v40 = vcvt.f32.s32 %v3407_v56  ;;  %v1289_v51 = vmul.f32 %v3532_v6, %v1096_v38  ;;  %v1217_v56 = vadd.s32 2, %v3150_v39 }
 0x262   : > { %vm1233_vm9 = vcmp.lt.s32.totalorder %v1217_v56, 40 }
 0x263   : > { %v3588_v38 = vsel %vm1233_vm9, 1.0, %v4319_v55 }
 0x264   : > { %1542 = vperm.xlu1 %2771, %v1281_v34   ;;  %1548 = vperm.xlu0 %2770, %v1283_v25   ;;  %v3562_v34 = vadd.s32 %v675_v35, %v673_v40  ;;  %v687_v35 = vcvt.f32.s32 %v3428_v19 }
 0x266   : > { %vm909_vm7 = vcmp.eq.s32.totalorder %v3562_v34, %v3163_v49  ;;  %vm911_vm11 = vcmp.eq.s32.totalorder %v3562_v34, %v3167_v50  ;;  %vm910_vm2 = vcmp.eq.s32.totalorder %v3562_v34, %v3155_v45  ;;  %v688_v19 = vshll.u32 %v687_v35, 16 }
 0x267   : > { %v1102_v36 = vsel %vm909_vm7, %v2984_v54, 0.0  ;;  %v1104_v56 = vsel %vm911_vm11, %v2989_v57, 0.0  ;;  %vm913_vm12 = vcmp.eq.s32.totalorder %v3562_v34, %v3179_v16  ;;  %vm912_vm13 = vcmp.eq.s32.totalorder %v3562_v34, %v3159_v46 }
 0x268   : > { %1545 = vperm.xlu1 %2771, %v1282_v9   ;;  %1554 = vperm.xlu0 %2770, %v1285_v12   ;;  %v1100_v12 = vsel %vm907_vm5, %v3001_v3, 0.0  ;;  %v1297_v7 = vmul.f32 %v3588_v38, %v1104_v56  ;;  %vm915_vm14 = vcmp.eq.s32.totalorder %v3562_v34, %v3193_v8  ;;  %vm914_vm15 = vcmp.eq.s32.totalorder %v3562_v34, %v3171_v15 }
 0x269   : > { %v1293_v23 = vmul.f32 %v3532_v6, %v1100_v12  ;;  %v1103_v12 = vsel %vm910_vm2, %v2982_v53, 0.0  ;;  %v1108_v44 = vsel %vm915_vm14, %v3001_v3, 0.0  ;;  %vm916_vm3 = vcmp.eq.s32.totalorder %v3562_v34, %v3187_v2 }
 0x26b   : > { %v3540_v28 = vpop.permute.xlu1 %1731  ;;  %v3544_v17 = vpop.permute.xlu0 %1728 }
 0x26c   : > { %1551 = vperm.xlu1 %2771, %v1284_v27   ;;  %1560 = vperm.xlu0 %2770, %v1287_v52   ;;  %v1099_v27 = vsel %vm906_vm6, %v2996_v61, 0.0 }
 0x26f   : > { %v3553_v41 = vpop.permute.xlu1 %1737  ;;  %v3557_v0 = vpop.permute.xlu0 %1734 }
 0x270   : > { %1557 = vperm.xlu1 %2771, %v1286_v18   ;;  %1566 = vperm.xlu0 %2770, %v1289_v51   ;;  %v1292_v18 = vmul.f32 %v3532_v6, %v1099_v27  ;;  %v1295_v51 = vmul.f32 %v3588_v38, %v1102_v36  ;;  %v1296_v6 = vmul.f32 %v3588_v38, %v1103_v12 }
 0x273   : > { %v3568_v25 = vpop.permute.xlu1 %1743  ;;  %v3572_v9 = vpop.permute.xlu0 %1740 }
 0x274   : > { %1563 = vperm.xlu1 %2771, %v1288_v42   ;;  %1572 = vperm.xlu0 %2770, %v1291_v21   ;;  %v686_v42 = vcvt.f32.s32 %v3422_v43  ;;  %v1218_v43 = vadd.s32 3, %v3150_v39 }
 0x276   : > { %v3618_v27 = vadd.s32 %v688_v19, %v686_v42  ;;  %vm1234_vm1 = vcmp.lt.s32.totalorder %v1218_v43, 40  ;;  %v1107_v42 = vsel %vm914_vm15, %v2996_v61, 0.0  ;;  %v700_v43 = vcvt.f32.s32 %v3448_v10 }
 0x277   : > { %v3580_v20 = vpop.permute.xlu1 %1749  ;;  %v3584_v52 = vpop.permute.xlu0 %1746 }
 0x278   : > { %4346 = vst [vmem:[#allocation7_spill] sm:$0xff] %v3580_v20  ;;  %1569 = vperm.xlu1 %2771, %v1290_v29   ;;  %1578 = vperm.xlu0 %2770, %v1293_v23   ;;  %v1106_v23 = vsel %vm913_vm12, %v2994_v60, 0.0  ;;  %vm917_vm0 = vcmp.eq.s32.totalorder %v3618_v27, %v3163_v49  ;;  %vm919_vm4 = vcmp.eq.s32.totalorder %v3618_v27, %v3167_v50  ;;  %v701_v10 = vshll.u32 %v700_v43, 16 }
 0x279   : > { %v1299_v35 = vmul.f32 %v3588_v38, %v1106_v23  ;;  %v1110_v12 = vsel %vm917_vm0, %v2984_v54, 0.0  ;;  %v3644_v23 = vsel %vm1234_vm1, 1.0, %v4319_v55  ;;  %v1112_v55 = vsel %vm919_vm4, %v2989_v57, 0.0 }
 0x27a   : > { %vm918_vm5 = vcmp.eq.s32.totalorder %v3618_v27, %v3155_v45  ;;  %vm921_vm6 = vcmp.eq.s32.totalorder %v3618_v27, %v3179_v16  ;;  %vm920_vm7 = vcmp.eq.s32.totalorder %v3618_v27, %v3159_v46  ;;  %vm923_vm9 = vcmp.eq.s32.totalorder %v3618_v27, %v3193_v8 }
 0x27b   : > { %v3596_v40 = vpop.permute.xlu1 %1755  ;;  %v3600_v63 = vpop.permute.xlu0 %1752  ;;  %vm922_vm10 = vcmp.eq.s32.totalorder %v3618_v27, %v3171_v15  ;;  %vm924_vm12 = vcmp.eq.s32.totalorder %v3618_v27, %v3187_v2 }
 0x27c   : > { %1575 = vperm.xlu1 %2771, %v1292_v18   ;;  %1584 = vperm.xlu0 %2770, %v1295_v51   ;;  %v1105_v18 = vsel %vm912_vm13, %v2991_v58, 0.0 }
 0x27d   : > { %v1298_v56 = vmul.f32 %v3588_v38, %v1105_v18  ;;  %v1303_v18 = vmul.f32 %v3644_v23, %v1110_v12  ;;  %v1305_v12 = vmul.f32 %v3644_v23, %v1112_v55 }
 0x27f   : > { %v3609_v21 = vpop.permute.xlu1 %1761  ;;  %v3613_v29 = vpop.permute.xlu0 %1758 }
 0x280   : > { %4347 = vst [vmem:[#allocation8_spill] sm:$0xff] %v3609_v21  ;;  %1581 = vperm.xlu1 %2771, %v1294_v48   ;;  %1590 = vperm.xlu0 %2770, %v1297_v7   ;;  %v1301_v48 = vmul.f32 %v3588_v38, %v1108_v44  ;;  %v1109_v44 = vsel %vm916_vm3, %v3003_v4, 0.0 }
 0x281   : > { %v1302_v34 = vmul.f32 %v3588_v38, %v1109_v44  ;;  %v1113_v44 = vsel %vm920_vm7, %v2991_v58, 0.0 }
 0x283   : > { %v3624_v36 = vpop.permute.xlu1 %1776  ;;  %v3628_v51 = vpop.permute.xlu0 %1764 }
 0x284   : > { %4348 = vst [vmem:[#allocation9_spill] sm:$0xff] %v3624_v36  ;;  %4349 = vst [vmem:[#allocation10_spill] sm:$0xff] %v3628_v51  ;;  %1587 = vperm.xlu1 %2771, %v1296_v6   ;;  %1596 = vperm.xlu0 %2770, %v1299_v35   ;;  %v1300_v6 = vmul.f32 %v3588_v38, %v1107_v42 }
 0x287   : > { %v3636_v19 = vpop.permute.xlu1 %1782  ;;  %v3640_v7 = vpop.permute.xlu0 %1779 }
 0x288   : > { %4350 = vst [vmem:[#allocation11_spill] sm:$0xff] %v3636_v19  ;;  %4351 = vst [vmem:[#allocation12_spill] sm:$0xff] %v3640_v7  ;;  %1593 = vperm.xlu1 %2771, %v1298_v56   ;;  %1602 = vperm.xlu0 %2770, %v1301_v48   ;;  %v699_v48 = vcvt.f32.s32 %v3444_v1  ;;  %v1219_v1 = vadd.s32 4, %v3150_v39 }
 0x28a   : > { %v3674_v43 = vadd.s32 %v701_v10, %v699_v48  ;;  %v1116_v10 = vsel %vm923_vm9, %v3001_v3, 0.0  ;;  %vm1235_vm2 = vcmp.lt.s32.totalorder %v1219_v1, 40  ;;  %v1306_v48 = vmul.f32 %v3644_v23, %v1113_v44 }
 0x28b   : > { %v3652_v35 = vpop.permute.xlu1 %1785  ;;  %v3656_v56 = vpop.permute.xlu0 %1767  ;;  %v713_v1 = vcvt.f32.s32 %v3487_v37  ;;  %vm2431_vm9 = vcmask 1041409  }
 0x28c   : > { %4352 = vst [vmem:[#allocation13_spill] sm:$0xff] %v3652_v35  ;;  %4353 = vst [vmem:[#allocation14_spill] sm:$0xff] %v3656_v56  ;;  %1599 = vperm.xlu1 %2771, %v1300_v6   ;;  %1608 = vperm.xlu0 %2770, %v1303_v18   ;;  %v1111_v6 = vsel %vm918_vm5, %v2982_v53, 0.0  ;;  %v1114_v35 = vsel %vm921_vm6, %v2994_v60, 0.0  ;;  %vm925_vm11 = vcmp.eq.s32.totalorder %v3674_v43, %v3163_v49 }
 0x28d   : > { %v1304_v55 = vmul.f32 %v3644_v23, %v1111_v6  ;;  %v1307_v18 = vmul.f32 %v3644_v23, %v1114_v35  ;;  %v1309_v35 = vmul.f32 %v3644_v23, %v1116_v10  ;;  %v1115_v6 = vsel %vm922_vm10, %v2996_v61, 0.0 }
 0x28e   : > { %vm927_vm13 = vcmp.eq.s32.totalorder %v3674_v43, %v3167_v50  ;;  %vm926_vm14 = vcmp.eq.s32.totalorder %v3674_v43, %v3155_v45  ;;  %v714_v37 = vshll.u32 %v713_v1, 16  ;;  %vm929_vm15 = vcmp.eq.s32.totalorder %v3674_v43, %v3179_v16 }
 0x28f   : > { %v3665_v42 = vpop.permute.xlu1 %1803  ;;  %v3669_v56 = vpop.permute.xlu0 %1800  ;;  %v1120_v19 = vsel %vm927_vm13, %v2989_v57, 0.0  ;;  %v1122_v7 = vsel %vm929_vm15, %v2994_v60, 0.0  ;;  %vm928_vm0 = vcmp.eq.s32.totalorder %v3674_v43, %v3159_v46  ;;  %v1220_v1 = vadd.s32 5, %v3150_v39 }
 0x290   : > { %1605 = vperm.xlu1 %2771, %v1302_v34   ;;  %1614 = vperm.xlu0 %2770, %v1305_v12   ;;  %vm931_vm1 = vcmp.eq.s32.totalorder %v3674_v43, %v3193_v8  ;;  %vm930_vm3 = vcmp.eq.s32.totalorder %v3674_v43, %v3171_v15  ;;  %vm932_vm6 = vcmp.eq.s32.totalorder %v3674_v43, %v3187_v2  ;;  %vm2433_vm10 = vcmask 1042434  }
 0x291   : > { %v1124_v36 = vsel %vm931_vm1, %v3001_v3, 0.0  ;;  %vm1236_vm4 = vcmp.lt.s32.totalorder %v1220_v1, 40  ;;  %v1125_v43 = vsel %vm932_vm6, %v3003_v4, 0.0 }
 0x293   : > { %v3680_v38 = vpop.permute.xlu1 %1788  ;;  %v3684_v34 = vpop.permute.xlu0 %1770 }
 0x294   : > { %4354 = vst [vmem:[#allocation15_spill] sm:$0xff] %v3680_v38  ;;  %4355 = vst [vmem:[#allocation16_spill] sm:$0xff] %v3684_v34  ;;  %1611 = vperm.xlu1 %2771, %v1304_v55   ;;  %1620 = vperm.xlu0 %2770, %v1307_v18   ;;  %v1118_v55 = vsel %vm925_vm11, %v2984_v54, 0.0  ;;  %v4357_v38 = vmov 0.0   ;;  %v1308_v18 = vmul.f32 %v3644_v23, %v1115_v6 }
 0x295   : > { %v3700_v51 = vsel %vm1235_vm2, 1.0, %v4357_v38  ;;  %vm2435_vm2 = vcmask 1043459  }
 0x296   : > { %v1311_v10 = vmul.f32 %v3700_v51, %v1118_v55  ;;  %v1313_v55 = vmul.f32 %v3700_v51, %v1120_v19 }
 0x297   : > { %v3692_v12 = vpop.permute.xlu1 %1773  ;;  %v3696_v34 = vpop.permute.xlu0 %1806 }
 0x298   : > { %4356 = vst [vmem:[#allocation17_spill] sm:$0xff] %v3692_v12  ;;  %1617 = vperm.xlu1 %2771, %v1306_v48   ;;  %1626 = vperm.xlu0 %2770, %v1309_v35   ;;  %v1117_v48 = vsel %vm924_vm12, %v3003_v4, 0.0  ;;  %v712_v35 = vcvt.f32.s32 %v3478_v26 }
 0x299   : > { %v1310_v27 = vmul.f32 %v3644_v23, %v1117_v48  ;;  %v1315_v23 = vmul.f32 %v3700_v51, %v1122_v7  ;;  %v1121_v48 = vsel %vm928_vm0, %v2991_v58, 0.0  ;;  %vm2437_vm0 = vcmask 1044484  }
 0x29a   : > { %v1314_v7 = vmul.f32 %v3700_v51, %v1121_v48  ;;  %v726_v48 = vcvt.f32.s32 %v3513_v62 }
 0x29b   : > { %v3708_v44 = vpop.permute.xlu1 %1809  ;;  %v3712_v12 = vpop.permute.xlu0 %1791 }
 0x29c   : > { %4358 = vst [vmem:[#allocation18_spill] sm:$0xff] %v3712_v12  ;;  %1623 = vperm.xlu1 %2771, %v1308_v18   ;;  %1632 = vperm.xlu0 %2770, %v1311_v10   ;;  %v1119_v12 = vsel %vm926_vm14, %v2982_v53, 0.0  ;;  %v3727_v10 = vadd.s32 %v714_v37, %v712_v35  ;;  %v1317_v35 = vmul.f32 %v3700_v51, %v1124_v36  ;;  %v727_v21 = vshll.u32 %v726_v48, 16 }
 0x29d   : > { %v1312_v26 = vmul.f32 %v3700_v51, %v1119_v12  ;;  %v3745_v12 = vsub.s32 %v2917_v5, %v2920_v11  ;;  %v3765_v11 = vadd.s32 6, %v3150_v39  ;;  %v725_v48 = vcvt.f32.s32 %v3508_v59 }
 0x29e   : > { %vm933_vm5 = vcmp.eq.s32.totalorder %v3727_v10, %v3163_v49  ;;  %vm935_vm7 = vcmp.eq.s32.totalorder %v3727_v10, %v3167_v50  ;;  %vm934_vm11 = vcmp.eq.s32.totalorder %v3727_v10, %v3155_v45  ;;  %vm937_vm12 = vcmp.eq.s32.totalorder %v3727_v10, %v3179_v16 }
 0x29f   : > { %v1828_v6 = vpop.permute.xlu1 %1827  ;;  %v1825_v18 = vpop.permute.xlu0 %1824  ;;  %v1126_v5 = vsel %vm933_vm5, %v2984_v54, 0.0  ;;  %vm1237_vm13 = vcmp.lt.s32.totalorder %v3765_v11, 40  ;;  %vm936_vm14 = vcmp.eq.s32.totalorder %v3727_v10, %v3159_v46  ;;  %v3796_v59 = vadd.s32 %v727_v21, %v725_v48 }
 0x2a0   : > { %1629 = vperm.xlu1 %2771, %v1310_v27   ;;  %1638 = vperm.xlu0 %2770, %v1313_v55   ;;  %v1123_v55 = vsel %vm930_vm3, %v2996_v61, 0.0  ;;  %v2310_v1 = vrot.slane %v1828_v6, %v3745_v12  ;;  %vm939_vm15 = vcmp.eq.s32.totalorder %v3727_v10, %v3193_v8  ;;  %v1129_v48 = vsel %vm936_vm14, %v2991_v58, 0.0 }
 0x2a1   : > { %v1316_v6 = vmul.f32 %v3700_v51, %v1123_v55  ;;  %vm938_vm1 = vcmp.eq.s32.totalorder %v3727_v10, %v3171_v15  ;;  %vm2439_vm3 = vcmask 1045509   ;;  %vm2441_vm5 = vcmask 1046534  }
 0x2a2   : > { %vm940_vm6 = vcmp.eq.s32.totalorder %v3727_v10, %v3187_v2  ;;  %vm944_vm14 = vcmp.eq.s32.totalorder %v3796_v59, %v3159_v46 }
 0x2a3   : > { %v3732_v19 = vpop.permute.xlu1 %1812  ;;  %v3736_v27 = vpop.permute.xlu0 %1794  ;;  %v1133_v10 = vsel %vm940_vm6, %v3003_v4, 0.0 }
 0x2a4   : > { %4359 = vst [vmem:[#allocation19_spill] sm:$0xff] %v3736_v27  ;;  %1635 = vperm.xlu1 %2771, %v1312_v26   ;;  %1644 = vperm.xlu0 %2770, %v1315_v23   ;;  %v3753_v26 = vsel %vm1236_vm4, 1.0, %v4357_v38  ;;  %v2306_v23 = vrot.slane %v1825_v18, %v3745_v12  ;;  %vm941_vm4 = vcmp.eq.s32.totalorder %v3796_v59, %v3163_v49 }
 0x2a6   : > { %v2522_v62 = vsel %vm2431_vm9, %v2310_v1, %v2306_v23  ;;  %v2274_v1 = vrot.slane %v3669_v56, %v3745_v12 }
 0x2a7   : > { %v3748_v37 = vpop.permute.xlu1 %1797  ;;  %v1831_v27 = vpop.permute.xlu0 %1830 }
 0x2a8   : > { %4360 = vst [vmem:[#allocation20_spill] sm:$0xff] %v3748_v37  ;;  %1641 = vperm.xlu1 %2771, %v1314_v7   ;;  %v2314_v36 = vrot.slane %v1831_v27, %v3745_v12  ;;  %1650 = vperm.xlu0 %2770, %v1317_v35   ;;  %v1319_v7 = vmul.f32 %v3753_v26, %v1126_v5  ;;  %v1128_v37 = vsel %vm935_vm7, %v2989_v57, 0.0  ;;  %vm2443_vm7 = vcmask 1047559  }
 0x2a9   : > { %v2278_v5 = vrot.slane %v3665_v42, %v3745_v12  ;;  %v2286_v42 = vrot.slane %v3708_v44, %v3745_v12 }
 0x2aa   : > { %v2523_v55 = vsel %vm2433_vm10, %v2314_v36, %v2522_v62  ;;  %v2282_v36 = vrot.slane %v3696_v34, %v3745_v12  ;;  %v1127_v62 = vsel %vm934_vm11, %v2982_v53, 0.0  ;;  %vm943_vm11 = vcmp.eq.s32.totalorder %v3796_v59, %v3167_v50 }
 0x2ab   : > { %v1834_v18 = vpop.permute.xlu1 %1833  ;;  %v1816_v35 = vpop.permute.xlu0 %1815  ;;  %v2515_v44 = vsel %vm2431_vm9, %v2278_v5, %v2274_v1  ;;  %v1132_v5 = vsel %vm939_vm15, %v3001_v3, 0.0  ;;  %vm947_vm15 = vcmp.eq.s32.totalorder %v3796_v59, %v3193_v8 }
 0x2ac   : > { %v2318_v27 = vrot.slane %v1834_v18, %v3745_v12  ;;  %1647 = vperm.xlu1 %2771, %v1316_v6   ;;  %1656 = vperm.xlu0 %2770, %v1319_v7   ;;  %v1318_v6 = vmul.f32 %v3700_v51, %v1125_v43  ;;  %v1321_v7 = vmul.f32 %v3753_v26, %v1128_v37 }
 0x2ad   : > { %v2290_v51 = vrot.slane %v3732_v19, %v3745_v12  ;;  %v2294_v37 = vrot.slane %v1816_v35, %v3745_v12  ;;  %v1320_v43 = vmul.f32 %v3753_v26, %v1127_v62  ;;  %v1322_v62 = vmul.f32 %v3753_v26, %v1129_v48 }
 0x2ae   : > { %v2524_v23 = vsel %vm2435_vm2, %v2318_v27, %v2523_v55  ;;  %v1130_v27 = vsel %vm937_vm12, %v2994_v60, 0.0  ;;  %v2516_v55 = vsel %vm2433_vm10, %v2282_v36, %v2515_v44  ;;  %vm942_vm12 = vcmp.eq.s32.totalorder %v3796_v59, %v3155_v45 }
 0x2af   : > { %v1852_v18 = vpop.permute.xlu1 %1851  ;;  %v1849_v56 = vpop.permute.xlu0 %1848  ;;  %v1323_v19 = vmul.f32 %v3753_v26, %v1130_v27 }
 0x2b0   : > { %v2342_v20 = vrot.slane %v1852_v18, %v3745_v12  ;;  %1653 = vperm.xlu1 %2771, %v1318_v6   ;;  %v2338_v34 = vrot.slane %v1849_v56, %v3745_v12  ;;  %1662 = vperm.xlu0 %2770, %v1321_v7   ;;  %v2517_v18 = vsel %vm2435_vm2, %v2286_v42, %v2516_v55  ;;  %v1134_v55 = vsel %vm941_vm4, %v2984_v54, 0.0 }
 0x2b1   : > { %v2518_v35 = vsel %vm2437_vm0, %v2290_v51, %v2517_v18  ;;  %v1131_v51 = vsel %vm938_vm1, %v2996_v61, 0.0  ;;  %vm946_vm1 = vcmp.eq.s32.totalorder %v3796_v59, %v3171_v15 }
 0x2b2   : > { %v2529_v21 = vsel %vm2431_vm9, %v2342_v20, %v2338_v34  ;;  %v2519_v1 = vsel %vm2439_vm3, %v2294_v37, %v2518_v35  ;;  %v1325_v34 = vmul.f32 %v3753_v26, %v1132_v5  ;;  %v3830_v37 = vsel %vm1237_vm13, 1.0, %v4357_v38 }
 0x2b3   : > { %v1837_v6 = vpop.permute.xlu1 %1836  ;;  %v1819_v56 = vpop.permute.xlu0 %1818  ;;  %v1324_v48 = vmul.f32 %v3753_v26, %v1131_v51  ;;  %v1136_v5 = vsel %vm943_vm11, %v2989_v57, 0.0  ;;  %vm945_vm13 = vcmp.eq.s32.totalorder %v3796_v59, %v3179_v16  ;;  %v1135_v51 = vsel %vm942_vm12, %v2982_v53, 0.0 }
 0x2b4   : > { %v2322_v7 = vrot.slane %v1837_v6, %v3745_v12  ;;  %1659 = vperm.xlu1 %2771, %v1320_v43   ;;  %v2298_v20 = vrot.slane %v1819_v56, %v3745_v12  ;;  %1668 = vperm.xlu0 %2770, %v1323_v19   ;;  %vm948_vm11 = vcmp.eq.s32.totalorder %v3796_v59, %v3187_v2 }
 0x2b6   : > { %v2525_v36 = vsel %vm2437_vm0, %v2322_v7, %v2524_v23  ;;  %v2520_v42 = vsel %vm2441_vm5, %v2298_v20, %v2519_v1  ;;  %v739_v23 = vcvt.f32.s32 %v3528_v14  ;;  %v1327_v7 = vmul.f32 %v3830_v37, %v1134_v55 }
 0x2b7   : > { %v1822_v27 = vpop.permute.xlu1 %1821  ;;  %v1855_v43 = vpop.permute.xlu0 %1854  ;;  %v1326_v1 = vmul.f32 %v3753_v26, %v1133_v10  ;;  %v1138_v55 = vsel %vm945_vm13, %v2994_v60, 0.0  ;;  %v1222_v26 = vadd.s32 7, %v3150_v39 }
 0x2b8   : > { %v2302_v44 = vrot.slane %v1822_v27, %v3745_v12  ;;  %1665 = vperm.xlu1 %2771, %v1322_v62   ;;  %v2346_v6 = vrot.slane %v1855_v43, %v3745_v12  ;;  %1674 = vperm.xlu0 %2770, %v1325_v34   ;;  %v740_v35 = vshll.u32 %v739_v23, 16  ;;  %v738_v62 = vcvt.f32.s32 %v3524_v13 }
 0x2b9   : > { %v1329_v34 = vmul.f32 %v3830_v37, %v1136_v5  ;;  %vm1238_vm6 = vcmp.lt.s32.totalorder %v1222_v26, 40 }
 0x2ba   : > { %v3839_v19 = vsel %vm2443_vm7, %v2302_v44, %v2520_v42  ;;  %v2530_v11 = vsel %vm2433_vm10, %v2346_v6, %v2529_v21  ;;  %v3862_v23 = vadd.s32 %v740_v35, %v738_v62  ;;  %v1139_v62 = vsel %vm946_vm1, %v2996_v61, 0.0 }
 0x2bb   : > { %v1858_v18 = vpop.permute.xlu1 %1857  ;;  %v1840_v56 = vpop.permute.xlu0 %1839 }
 0x2bc   : > { %v2350_v14 = vrot.slane %v1858_v18, %v3745_v12  ;;  %1671 = vperm.xlu1 %2771, %v1324_v48   ;;  %v2326_v20 = vrot.slane %v1840_v56, %v3745_v12  ;;  %1680 = vperm.xlu0 %2770, %v1327_v7   ;;  %v1137_v18 = vsel %vm944_vm14, %v2991_v58, 0.0  ;;  %vm949_vm4 = vcmp.eq.s32.totalorder %v3862_v23, %v3163_v49 }
 0x2bd   : > { %v1330_v5 = vmul.f32 %v3830_v37, %v1137_v18  ;;  %v3887_v49 = vsel %vm1238_vm6, 1.0, %v4357_v38  ;;  %vm951_vm12 = vcmp.eq.s32.totalorder %v3862_v23, %v3167_v50  ;;  %vm950_vm13 = vcmp.eq.s32.totalorder %v3862_v23, %v3155_v45 }
 0x2be   : > { %v2531_v21 = vsel %vm2435_vm2, %v2350_v14, %v2530_v11  ;;  %v2526_v42 = vsel %vm2439_vm3, %v2326_v20, %v2525_v36  ;;  %v1328_v36 = vmul.f32 %v3830_v37, %v1135_v51  ;;  %v1331_v11 = vmul.f32 %v3830_v37, %v1138_v55 }
 0x2bf   : > { %v1876_v27 = vpop.permute.xlu1 %1875  ;;  %v1873_v43 = vpop.permute.xlu0 %1872  ;;  %v1140_v14 = vsel %vm947_vm15, %v3001_v3, 0.0  ;;  %v1142_v51 = vsel %vm949_vm4, %v2984_v54, 0.0  ;;  %v1141_v55 = vsel %vm948_vm11, %v3003_v4, 0.0  ;;  %v1144_v26 = vsel %vm951_vm12, %v2989_v57, 0.0 }
 0x2c0   : > { %v2374_v44 = vrot.slane %v1876_v27, %v3745_v12  ;;  %1677 = vperm.xlu1 %2771, %v1326_v1   ;;  %v2370_v13 = vrot.slane %v1873_v43, %v3745_v12  ;;  %1686 = vperm.xlu0 %2770, %v1329_v34   ;;  %v1333_v1 = vmul.f32 %v3830_v37, %v1140_v14  ;;  %v1143_v57 = vsel %vm950_vm13, %v2982_v53, 0.0 }
 0x2c1   : > { %v1335_v38 = vmul.f32 %v3887_v49, %v1142_v51  ;;  %vm953_vm14 = vcmp.eq.s32.totalorder %v3862_v23, %v3179_v16  ;;  %v1337_v18 = vmul.f32 %v3887_v49, %v1144_v26  ;;  %vm952_vm15 = vcmp.eq.s32.totalorder %v3862_v23, %v3159_v46 }
 0x2c2   : > { %v2536_v6 = vsel %vm2431_vm9, %v2374_v44, %v2370_v13  ;;  %v1332_v44 = vmul.f32 %v3830_v37, %v1139_v62  ;;  %vm955_vm1 = vcmp.eq.s32.totalorder %v3862_v23, %v3193_v8  ;;  %vm954_vm4 = vcmp.eq.s32.totalorder %v3862_v23, %v3171_v15 }
 0x2c3   : > { %v1861_v48 = vpop.permute.xlu1 %1860  ;;  %v1843_v10 = vpop.permute.xlu0 %1842  ;;  %v1148_v46 = vsel %vm955_vm1, %v3001_v3, 0.0  ;;  %vm1010_vm6 = vcmp.eq.s32.totalorder %v3357_v47, %v3171_v15  ;;  %vm956_vm11 = vcmp.eq.s32.totalorder %v3862_v23, %v3187_v2  ;;  %vm1011_vm12 = vcmp.eq.s32.totalorder %v3357_v47, %v3193_v8 }
 0x2c4   : > { %v2354_v7 = vrot.slane %v1861_v48, %v3745_v12  ;;  %1683 = vperm.xlu1 %2771, %v1328_v36   ;;  %v2330_v39 = vrot.slane %v1843_v10, %v3745_v12  ;;  %1692 = vperm.xlu0 %2770, %v1331_v11   ;;  %v1146_v10 = vsel %vm953_vm14, %v2994_v60, 0.0  ;;  %v1204_v26 = vsel %vm1011_vm12, %v3001_v3, 0.0 }
 0x2c5   : > { %vm1012_vm13 = vcmp.eq.s32.totalorder %v3357_v47, %v3187_v2 }
 0x2c6   : > { %v2532_v56 = vsel %vm2437_vm0, %v2354_v7, %v2531_v21  ;;  %v2527_v35 = vsel %vm2441_vm5, %v2330_v39, %v2526_v42  ;;  %v1339_v39 = vmul.f32 %v3887_v49, %v1146_v10 }
 0x2c7   : > { %v1846_v20 = vpop.permute.xlu1 %1845  ;;  %v1879_v34 = vpop.permute.xlu0 %1878 }
 0x2c8   : > { %v2334_v27 = vrot.slane %v1846_v20, %v3745_v12  ;;  %1689 = vperm.xlu1 %2771, %v1330_v5   ;;  %v2378_v21 = vrot.slane %v1879_v34, %v3745_v12  ;;  %1698 = vperm.xlu0 %2770, %v1333_v1   ;;  %v1147_v34 = vsel %vm954_vm4, %v2996_v61, 0.0 }
 0x2ca   : > { %v3895_v42 = vsel %vm2443_vm7, %v2334_v27, %v2527_v35  ;;  %v2537_v43 = vsel %vm2433_vm10, %v2378_v21, %v2536_v6  ;;  %v1334_v6 = vmul.f32 %v3830_v37, %v1141_v55  ;;  %v1336_v37 = vmul.f32 %v3887_v49, %v1143_v57 }
 0x2cb   : > { %v1882_v54 = vpop.permute.xlu1 %1881  ;;  %v1864_v13 = vpop.permute.xlu0 %1863  ;;  %v1341_v27 = vmul.f32 %v3887_v49, %v1148_v46  ;;  %v1205_v57 = vsel %vm1012_vm13, %v3003_v4, 0.0 }
 0x2cc   : > { %v2382_v59 = vrot.slane %v1882_v54, %v3745_v12  ;;  %1695 = vperm.xlu1 %2771, %v1332_v44   ;;  %v2358_v50 = vrot.slane %v1864_v13, %v3745_v12  ;;  %1704 = vperm.xlu0 %2770, %v1335_v38   ;;  %v1203_v44 = vsel %vm1010_vm6, %v2996_v61, 0.0  ;;  %v1340_v54 = vmul.f32 %v3887_v49, %v1147_v34 }
 0x2cd   : > { %v1396_v61 = vmul.f32 %v3381_v24, %v1203_v44 }
 0x2ce   : > { %v2538_v36 = vsel %vm2435_vm2, %v2382_v59, %v2537_v43  ;;  %v2533_v48 = vsel %vm2439_vm3, %v2358_v50, %v2532_v56  ;;  %v1145_v56 = vsel %vm952_vm15, %v2991_v58, 0.0  ;;  %v1149_v59 = vsel %vm956_vm11, %v3003_v4, 0.0 }
 0x2cf   : > { %v1900_v11 = vpop.permute.xlu1 %1899  ;;  %v1897_v45 = vpop.permute.xlu0 %1896  ;;  %v1338_v58 = vmul.f32 %v3887_v49, %v1145_v56  ;;  %v1342_v50 = vmul.f32 %v3887_v49, %v1149_v59 }
 0x2d0   : > { %v2406_v7 = vrot.slane %v1900_v11, %v3745_v12  ;;  %1701 = vperm.xlu1 %2771, %v1334_v6   ;;  %v2402_v16 = vrot.slane %v1897_v45, %v3745_v12  ;;  %1710 = vperm.xlu0 %2770, %v1337_v18   ;;  %v1398_v45 = vmul.f32 %v3381_v24, %v1205_v57 }
 0x2d2   : > { %v2543_v14 = vsel %vm2431_vm9, %v2406_v7, %v2402_v16 }
 0x2d3   : > { %v1885_v53 = vpop.permute.xlu1 %1884  ;;  %v1867_v5 = vpop.permute.xlu0 %1866 }
 0x2d4   : > { %v2386_v60 = vrot.slane %v1885_v53, %v3745_v12  ;;  %1707 = vperm.xlu1 %2771, %v1336_v37   ;;  %v2362_v35 = vrot.slane %v1867_v5, %v3745_v12  ;;  %1716 = vperm.xlu0 %2770, %v1339_v39  }
 0x2d6   : > { %v3932_v20 = vsel %vm2437_vm0, %v2386_v60, %v2538_v36  ;;  %v2534_v1 = vsel %vm2441_vm5, %v2362_v35, %v2533_v48  ;;  %v1397_v48 = vmul.f32 %v3381_v24, %v1204_v26 }
 0x2d7   : > { %v1870_v62 = vpop.permute.xlu1 %1869  ;;  %v1903_v21 = vpop.permute.xlu0 %1902 }
 0x2d8   : > { %v2366_v51 = vrot.slane %v1870_v62, %v3745_v12  ;;  %1713 = vperm.xlu1 %2771, %v1338_v58   ;;  %v2410_v15 = vrot.slane %v1903_v21, %v3745_v12  ;;  %1722 = vperm.xlu0 %2770, %v1341_v27  }
 0x2da   : > { %v3946_v43 = vsel %vm2443_vm7, %v2366_v51, %v2534_v1  ;;  %v3950_v38 = vsel %vm2433_vm10, %v2410_v15, %v2543_v14 }
 0x2db   : > { %v1537_v55 = vpop.permute.xlu1 %1536  ;;  %v1540_v13 = vpop.permute.xlu0 %1539 }
 0x2dc   : > { %v1922_v23 = vrot.slane %v1537_v55, %v3745_v12  ;;  %1719 = vperm.xlu1 %2771, %v1340_v54   ;;  %v1926_v8 = vrot.slane %v1540_v13, %v3745_v12  ;;  %1887 = vperm.xlu0 %2770, %v1396_v61  }
 0x2de   : > { %v2432_v36 = vsel %vm2431_vm9, %v1926_v8, %v1922_v23 }
 0x2df   : > { %v1543_v6 = vpop.permute.xlu1 %1542  ;;  %v1549_v18 = vpop.permute.xlu0 %1548 }
 0x2e0   : > { %v1930_v11 = vrot.slane %v1543_v6, %v3745_v12  ;;  %1725 = vperm.xlu1 %2771, %v1342_v50   ;;  %1890 = vperm.xlu0 %2770, %v1397_v48   ;;  %v1938_v49 = vrot.slane %v1549_v18, %v3745_v12 }
 0x2e2   : > { %v2434_v3 = vsel %vm2433_vm10, %v1930_v11, %v2432_v36 }
 0x2e3   : > { %v1546_v7 = vpop.permute.xlu1 %1545  ;;  %v1555_v47 = vpop.permute.xlu0 %1554 }
 0x2e4   : > { %v1934_v2 = vrot.slane %v1546_v7, %v3745_v12  ;;  %1905 = vperm.xlu1 %2771, %v3464_v22   ;;  %1893 = vperm.xlu0 %2770, %v1398_v45   ;;  %v1946_v24 = vrot.slane %v1555_v47, %v3745_v12 }
 0x2e6   : > { %v2436_v10 = vsel %vm2435_vm2, %v1934_v2, %v2434_v3 }
 0x2e7   : > { %v1552_v16 = vpop.permute.xlu1 %1551  ;;  %v2438_v37 = vsel %vm2437_vm0, %v1938_v49, %v2436_v10  ;;  %v1561_v14 = vpop.permute.xlu0 %1560 }
 0x2e8   : > { %v1942_v4 = vrot.slane %v1552_v16, %v3745_v12  ;;  %1908 = vperm.xlu1 %2771, %v3480_v31   ;;  %1914 = vperm.xlu0 %2770, %v3482_v32   ;;  %v1954_v35 = vrot.slane %v1561_v14, %v3745_v12 }
 0x2ea   : > { %v2440_v53 = vsel %vm2439_vm3, %v1942_v4, %v2438_v37 }
 0x2eb   : > { %v1558_v22 = vpop.permute.xlu1 %1557  ;;  %v2442_v39 = vsel %vm2441_vm5, %v1946_v24, %v2440_v53  ;;  %v1567_v60 = vpop.permute.xlu0 %1566 }
 0x2ec   : > { %v1950_v56 = vrot.slane %v1558_v22, %v3745_v12  ;;  %1911 = vperm.xlu1 %2771, %v3484_v33   ;;  %v1962_v32 = vrot.slane %v1567_v60, %v3745_v12 }
 0x2ee   : > { %v2444_v5 = vsel %vm2443_vm7, %v1950_v56, %v2442_v39 }
 0x2ef   : > { %v1564_v46 = vpop.permute.xlu1 %1563  ;;  %v1573_v58 = vpop.permute.xlu0 %1572  ;;  %v2566_v50 = vsel %vm637_vm8, %v2444_v5, 0.0 }
 0x2f0   : > { %v1958_v31 = vrot.slane %v1564_v46, %v3745_v12  ;;  %1917 = vperm.xlu1 %2771, %v3495_v30   ;;  %v1970_v51 = vrot.slane %v1573_v58, %v3745_v12 }
 0x2f2   : > { %v2445_v1 = vsel %vm2431_vm9, %v1958_v31, %v1954_v35 }
 0x2f3   : > { %v1570_v62 = vpop.permute.xlu1 %1569  ;;  %v2446_v27 = vsel %vm2433_vm10, %v1962_v32, %v2445_v1  ;;  %v1579_v33 = vpop.permute.xlu0 %1578 }
 0x2f4   : > { %v1966_v34 = vrot.slane %v1570_v62, %v3745_v12  ;;  %v1978_v55 = vrot.slane %v1579_v33, %v3745_v12 }
 0x2f6   : > { %v2447_v21 = vsel %vm2435_vm2, %v1966_v34, %v2446_v27 }
 0x2f7   : > { %v1576_v44 = vpop.permute.xlu1 %1575  ;;  %v2448_v15 = vsel %vm2437_vm0, %v1970_v51, %v2447_v21  ;;  %v1585_v30 = vpop.permute.xlu0 %1584 }
 0x2f8   : > { %v1974_v54 = vrot.slane %v1576_v44, %v3745_v12  ;;  %v1986_v48 = vrot.slane %v1585_v30, %v3745_v12 }
 0x2fa   : > { %v2449_v61 = vsel %vm2439_vm3, %v1974_v54, %v2448_v15 }
 0x2fb   : > { %v1582_v59 = vpop.permute.xlu1 %1581  ;;  %v2450_v23 = vsel %vm2441_vm5, %v1978_v55, %v2449_v61  ;;  %v1591_v26 = vpop.permute.xlu0 %1590 }
 0x2fc   : > { %v1982_v13 = vrot.slane %v1582_v59, %v3745_v12  ;;  %v1994_v3 = vrot.slane %v1591_v26, %v3745_v12 }
 0x2fe   : > { %v2451_v8 = vsel %vm2443_vm7, %v1982_v13, %v2450_v23 }
 0x2ff   : > { %v2567_v36 = vsel %vm637_vm8, %v2451_v8, 0.0  ;;  %v1588_v6 = vpop.permute.xlu1 %1587  ;;  %v1597_v57 = vpop.permute.xlu0 %1596 }
 0x300   : > { %v2568_v11 = vadd.f32 %v2567_v36, %v2566_v50  ;;  %v1990_v18 = vrot.slane %v1588_v6, %v3745_v12  ;;  %v2002_v10 = vrot.slane %v1597_v57, %v3745_v12  ;;  %v2182_v6 = vrot.slane %v3540_v28, %v3745_v12 }
 0x301   : > { %v2194_v28 = vrot.slane %v3572_v9, %v3745_v12  ;;  %v2210_v9 = vrot.slane %v3600_v63, %v3745_v12 }
 0x302   : > { %v2452_v7 = vsel %vm2431_vm9, %v1990_v18, %v1986_v48  ;;  %v2178_v48 = vrot.slane %v3544_v17, %v3745_v12  ;;  %v2198_v17 = vrot.slane %v3568_v25, %v3745_v12 }
 0x303   : > { %v1594_v45 = vpop.permute.xlu1 %1593  ;;  %v2453_v2 = vsel %vm2433_vm10, %v1994_v3, %v2452_v7  ;;  %v1603_v49 = vpop.permute.xlu0 %1602  ;;  %v2190_v7 = vrot.slane %v3553_v41, %v3745_v12  ;;  %v2202_v41 = vrot.slane %v3584_v52, %v3745_v12 }
 0x304   : > { %v1998_v47 = vrot.slane %v1594_v45, %v3745_v12  ;;  %v2010_v53 = vrot.slane %v1603_v49, %v3745_v12  ;;  %v2494_v3 = vsel %vm2431_vm9, %v2182_v6, %v2178_v48 }
 0x306   : > { %v2454_v16 = vsel %vm2435_vm2, %v1998_v47, %v2453_v2 }
 0x307   : > { %v1600_v37 = vpop.permute.xlu1 %1599  ;;  %v2455_v4 = vsel %vm2437_vm0, %v2002_v10, %v2454_v16  ;;  %v1609_v24 = vpop.permute.xlu0 %1608  ;;  %v2214_v16 = vrot.slane %v3596_v40, %v3745_v12 }
 0x308   : > { %v2006_v14 = vrot.slane %v1600_v37, %v3745_v12  ;;  %v2218_v37 = vrot.slane %v3613_v29, %v3745_v12  ;;  %v2018_v25 = vrot.slane %v1609_v24, %v3745_v12 }
 0x309   : > { %v2501_v24 = vsel %vm2431_vm9, %v2214_v16, %v2210_v9 }
 0x30a   : > { %v2456_v22 = vsel %vm2439_vm3, %v2006_v14, %v2455_v4 }
 0x30b   : > { %v1606_v39 = vpop.permute.xlu1 %1605  ;;  %v2457_v56 = vsel %vm2441_vm5, %v2010_v53, %v2456_v22  ;;  %v4012_v5 = vpop.permute.xlu0 %1614  ;;  %v4361_v53 = vld [vmem:[#allocation7_spill] sm:$0xff] }
 0x30c   : > { %v2014_v60 = vrot.slane %v1606_v39, %v3745_v12  ;;  %v2206_v22 = vrot.slane %v4361_v53, %v3745_v12 }
 0x30e   : > { %v2458_v46 = vsel %vm2443_vm7, %v2014_v60, %v2457_v56  ;;  %v2026_v60 = vrot.slane %v4012_v5, %v3745_v12 }
 0x30f   : > { %v2569_v35 = vsel %vm637_vm8, %v2458_v46, 0.0  ;;  %v1612_v31 = vpop.permute.xlu1 %1611  ;;  %v4018_v32 = vpop.permute.xlu0 %1620 }
 0x310   : > { %v4016_v58 = vadd.f32 %v2569_v35, %v2568_v11  ;;  %v2186_v11 = vrot.slane %v3557_v0, %v3745_v12  ;;  %v2022_v49 = vrot.slane %v1612_v31, %v3745_v12  ;;  %v4362_v35 = vld [vmem:[#allocation8_spill] sm:$0xff] }
 0x311   : > { %v2222_v31 = vrot.slane %v4362_v35, %v3745_v12 }
 0x312   : > { %v2495_v45 = vsel %vm2433_vm10, %v2186_v11, %v2494_v3  ;;  %v2459_v40 = vsel %vm2431_vm9, %v2022_v49, %v2018_v25  ;;  %v4364_v49 = vld [vmem:[#allocation12_spill] sm:$0xff] }
 0x313   : > { %v4020_v1 = vpop.permute.xlu1 %1617  ;;  %v4022_v62 = vpop.permute.xlu0 %1626  ;;  %v2496_v0 = vsel %vm2435_vm2, %v2190_v7, %v2495_v45  ;;  %v2460_v48 = vsel %vm2433_vm10, %v2026_v60, %v2459_v40  ;;  %v4363_v7 = vld [vmem:[#allocation9_spill] sm:$0xff] }
 0x314   : > { %v2497_v10 = vsel %vm2437_vm0, %v2194_v28, %v2496_v0  ;;  %v2030_v63 = vrot.slane %v4020_v1, %v3745_v12  ;;  %v2242_v45 = vrot.slane %v4363_v7, %v3745_v12  ;;  %v2034_v28 = vrot.slane %v4018_v32, %v3745_v12 }
 0x315   : > { %v2498_v52 = vsel %vm2439_vm3, %v2198_v17, %v2497_v10  ;;  %v2246_v10 = vrot.slane %v4364_v49, %v3745_v12 }
 0x316   : > { %v4093_v29 = vsel %vm2441_vm5, %v2202_v41, %v2498_v52  ;;  %v2461_v17 = vsel %vm2435_vm2, %v2030_v63, %v2460_v48 }
 0x317   : > { %v4024_v27 = vpop.permute.xlu1 %1623  ;;  %v1633_v34 = vpop.permute.xlu0 %1632  ;;  %v2462_v9 = vsel %vm2437_vm0, %v2034_v28, %v2461_v17 }
 0x318   : > { %v2050_v56 = vrot.slane %v1633_v34, %v3745_v12 }
 0x31b   : > { %v4026_v33 = vpop.permute.xlu1 %1629  ;;  %v4028_v51 = vpop.permute.xlu0 %1638 }
 0x31c   : > { %v2058_v11 = vrot.slane %v4028_v51, %v3745_v12  ;;  %v2046_v40 = vrot.slane %v4026_v33, %v3745_v12 }
 0x31f   : > { %v1636_v21 = vpop.permute.xlu1 %1635  ;;  %v4030_v44 = vpop.permute.xlu0 %1644 }
 0x320   : > { %v2054_v4 = vrot.slane %v1636_v21, %v3745_v12  ;;  %v4102_v21 = vsel %vm2433_vm10, %v2218_v37, %v2501_v24  ;;  %v2066_v37 = vrot.slane %v4030_v44, %v3745_v12 }
 0x322   : > { %v2466_v1 = vsel %vm2431_vm9, %v2054_v4, %v2050_v56  ;;  %v2042_v4 = vrot.slane %v4022_v62, %v3745_v12 }
 0x323   : > { %v4032_v15 = vpop.permute.xlu1 %1641  ;;  %v4034_v54 = vpop.permute.xlu0 %1650  ;;  %v2467_v0 = vsel %vm2433_vm10, %v2058_v11, %v2466_v1 }
 0x324   : > { %v2062_v34 = vrot.slane %v4032_v15, %v3745_v12  ;;  %v2038_v15 = vrot.slane %v4024_v27, %v3745_v12 }
 0x326   : > { %v2468_v41 = vsel %vm2435_vm2, %v2062_v34, %v2467_v0  ;;  %v2463_v52 = vsel %vm2439_vm3, %v2038_v15, %v2462_v9 }
 0x327   : > { %v4036_v30 = vpop.permute.xlu1 %1647  ;;  %v1657_v55 = vpop.permute.xlu0 %1656  ;;  %v2469_v44 = vsel %vm2437_vm0, %v2066_v37, %v2468_v41  ;;  %v2464_v48 = vsel %vm2441_vm5, %v2042_v4, %v2463_v52 }
 0x328   : > { %v2082_v5 = vrot.slane %v1657_v55, %v3745_v12  ;;  %v2070_v32 = vrot.slane %v4036_v30, %v3745_v12 }
 0x32a   : > { %v2470_v56 = vsel %vm2439_vm3, %v2070_v32, %v2469_v44 }
 0x32b   : > { %v4038_v61 = vpop.permute.xlu1 %1653  ;;  %v4040_v59 = vpop.permute.xlu0 %1662 }
 0x32c   : > { %v2090_v27 = vrot.slane %v4040_v59, %v3745_v12  ;;  %v2078_v62 = vrot.slane %v4038_v61, %v3745_v12  ;;  %v2074_v61 = vrot.slane %v4034_v54, %v3745_v12 }
 0x32e   : > { %v2471_v28 = vsel %vm2441_vm5, %v2074_v61, %v2470_v56  ;;  %v4369_v56 = vld [vmem:[#allocation15_spill] sm:$0xff] }
 0x32f   : > { %v1660_v23 = vpop.permute.xlu1 %1659  ;;  %v4042_v13 = vpop.permute.xlu0 %1668 }
 0x330   : > { %v2086_v46 = vrot.slane %v1660_v23, %v3745_v12  ;;  %v2098_v24 = vrot.slane %v4042_v13, %v3745_v12 }
 0x332   : > { %v2473_v51 = vsel %vm2431_vm9, %v2086_v46, %v2082_v5  ;;  %v2465_v5 = vsel %vm2443_vm7, %v2046_v40, %v2464_v48 }
 0x333   : > { %v4044_v26 = vpop.permute.xlu1 %1665  ;;  %v4046_v8 = vpop.permute.xlu0 %1674  ;;  %v2474_v30 = vsel %vm2433_vm10, %v2090_v27, %v2473_v51  ;;  %v2571_v49 = vsel %vm637_vm8, %v2465_v5, 0.0  ;;  %v2500_v27 = vsel %vm2443_vm7, %v2206_v22, %v4093_v29  ;;  %v2503_v22 = vsel %vm2435_vm2, %v2222_v31, %v4102_v21  ;;  %v4368_v31 = vld [vmem:[#allocation14_spill] sm:$0xff] }
 0x334   : > { %v2094_v55 = vrot.slane %v4044_v26, %v3745_v12  ;;  %v2106_v17 = vrot.slane %v4046_v8, %v3745_v12  ;;  %v2572_v29 = vadd.f32 %v2571_v49, %v4016_v58  ;;  %v2230_v58 = vrot.slane %v4368_v31, %v3745_v12 }
 0x336   : > { %v2475_v63 = vsel %vm2435_vm2, %v2094_v55, %v2474_v30 }
 0x337   : > { %v4048_v50 = vpop.permute.xlu1 %1671  ;;  %v1681_v36 = vpop.permute.xlu0 %1680  ;;  %v2476_v11 = vsel %vm2437_vm0, %v2098_v24, %v2475_v63  ;;  %v4370_v24 = vld [vmem:[#allocation16_spill] sm:$0xff] }
 0x33b   : > { %v4056_v18 = vpop.permute.xlu1 %1677  ;;  %v4058_v57 = vpop.permute.xlu0 %1686 }
 0x33c   : > { %v2122_v59 = vrot.slane %v4058_v57, %v3745_v12 }
 0x33f   : > { %v1684_v2 = vpop.permute.xlu1 %1683  ;;  %v4066_v47 = vpop.permute.xlu0 %1692 }
 0x340   : > { %v2118_v23 = vrot.slane %v1684_v2, %v3745_v12  ;;  %v2114_v2 = vrot.slane %v1681_v36, %v3745_v12  ;;  %v2130_v13 = vrot.slane %v4066_v47, %v3745_v12  ;;  %v2472_v47 = vsel %vm2443_vm7, %v2078_v62, %v2471_v28 }
 0x341   : > { %v2258_v62 = vrot.slane %v4369_v56, %v3745_v12 }
 0x342   : > { %v2480_v26 = vsel %vm2431_vm9, %v2118_v23, %v2114_v2 }
 0x343   : > { %v1690_v14 = vpop.permute.xlu1 %1689  ;;  %v4085_v39 = vpop.permute.xlu0 %1698  ;;  %v2481_v57 = vsel %vm2433_vm10, %v2122_v59, %v2480_v26  ;;  %v4367_v59 = vld [vmem:[#allocation13_spill] sm:$0xff] }
 0x344   : > { %v2126_v36 = vrot.slane %v1690_v14, %v3745_v12  ;;  %v2102_v14 = vrot.slane %v4048_v50, %v3745_v12  ;;  %v2138_v8 = vrot.slane %v4085_v39, %v3745_v12  ;;  %v2508_v39 = vsel %vm2431_vm9, %v2246_v10, %v2242_v45  ;;  %v4366_v10 = vld [vmem:[#allocation10_spill] sm:$0xff] }
 0x345   : > { %v2226_v30 = vrot.slane %v4366_v10, %v3745_v12  ;;  %v2254_v40 = vrot.slane %v4367_v59, %v3745_v12  ;;  %v2587_v10 = vsel %vm637_vm8, %v3839_v19, 0.0 }
 0x346   : > { %v2482_v33 = vsel %vm2435_vm2, %v2126_v36, %v2481_v57  ;;  %v2477_v23 = vsel %vm2439_vm3, %v2102_v14, %v2476_v11  ;;  %v2573_v36 = vsel %vm637_vm8, %v2472_v47, 0.0  ;;  %v2234_v57 = vrot.slane %v4370_v24, %v3745_v12 }
 0x347   : > { %v1696_v6 = vpop.permute.xlu1 %1695  ;;  %v1705_v3 = vpop.permute.xlu0 %1704  ;;  %v2483_v54 = vsel %vm2437_vm0, %v2130_v13, %v2482_v33  ;;  %v2478_v41 = vsel %vm2441_vm5, %v2106_v17, %v2477_v23  ;;  %v2574_v21 = vadd.f32 %v2573_v36, %v2572_v29  ;;  %v2504_v5 = vsel %vm2437_vm0, %v2226_v30, %v2503_v22 }
 0x348   : > { %v2134_v46 = vrot.slane %v1696_v6, %v3745_v12  ;;  %v2146_v1 = vrot.slane %v1705_v3, %v3745_v12  ;;  %v2110_v6 = vrot.slane %v4056_v18, %v3745_v12  ;;  %v2505_v17 = vsel %vm2439_vm3, %v2230_v58, %v2504_v5  ;;  %v4376_v5 = vld [vmem:[#allocation5_spill] sm:$0xff] }
 0x34a   : > { %v2484_v51 = vsel %vm2439_vm3, %v2134_v46, %v2483_v54  ;;  %v2479_v37 = vsel %vm2443_vm7, %v2110_v6, %v2478_v41  ;;  %v4373_v6 = vld [vmem:[#allocation19_spill] sm:$0xff]  ;;  %v4374_v54 = vld [vmem:[#allocation20_spill] sm:$0xff] }
 0x34b   : > { %v1702_v16 = vpop.permute.xlu1 %1701  ;;  %v1711_v25 = vpop.permute.xlu0 %1710  ;;  %v2575_v44 = vsel %vm637_vm8, %v2479_v37, 0.0 }
 0x34c   : > { %v2154_v15 = vrot.slane %v1711_v25, %v3745_v12  ;;  %v2142_v55 = vrot.slane %v1702_v16, %v3745_v12  ;;  %v4365_v16 = vld [vmem:[#allocation11_spill] sm:$0xff]  ;;  %v2485_v25 = vsel %vm2441_vm5, %v2138_v8, %v2484_v51  ;;  %v2576_v61 = vadd.f32 %v2575_v44, %v2574_v21 }
 0x34d   : > { %v2250_v9 = vrot.slane %v4365_v16, %v3745_v12 }
 0x34e   : > { %v2486_v52 = vsel %vm2443_vm7, %v2142_v55, %v2485_v25  ;;  %v2506_v55 = vsel %vm2441_vm5, %v2234_v57, %v2505_v17 }
 0x34f   : > { %v1708_v60 = vpop.permute.xlu1 %1707  ;;  %v1717_v50 = vpop.permute.xlu0 %1716  ;;  %v2509_v35 = vsel %vm2433_vm10, %v2250_v9, %v2508_v39 }
 0x350   : > { %v2150_v34 = vrot.slane %v1708_v60, %v3745_v12  ;;  %v2162_v53 = vrot.slane %v1717_v50, %v3745_v12  ;;  %v2577_v60 = vsel %vm637_vm8, %v2486_v52, 0.0  ;;  %v4372_v50 = vld [vmem:[#allocation18_spill] sm:$0xff]  ;;  %v2510_v23 = vsel %vm2435_vm2, %v2254_v40, %v2509_v35 }
 0x351   : > { %v2262_v48 = vrot.slane %v4372_v50, %v3745_v12  ;;  %v2511_v51 = vsel %vm2437_vm0, %v2258_v62, %v2510_v23  ;;  %v2589_v35 = vsel %vm637_vm8, %v3895_v42, 0.0 }
 0x352   : > { %v2487_v3 = vsel %vm2431_vm9, %v2150_v34, %v2146_v1  ;;  %v4371_v1 = vld [vmem:[#allocation17_spill] sm:$0xff] }
 0x353   : > { %v1714_v0 = vpop.permute.xlu1 %1713  ;;  %v1723_v2 = vpop.permute.xlu0 %1722  ;;  %v2488_v32 = vsel %vm2433_vm10, %v2154_v15, %v2487_v3  ;;  %v2238_v34 = vrot.slane %v4371_v1, %v3745_v12  ;;  %v2266_v3 = vrot.slane %v4373_v6, %v3745_v12  ;;  %v2270_v15 = vrot.slane %v4374_v54, %v3745_v12 }
 0x354   : > { %v2158_v18 = vrot.slane %v1714_v0, %v3745_v12  ;;  %v2170_v33 = vrot.slane %v1723_v2, %v3745_v12  ;;  %v2578_v0 = vadd.f32 %v2577_v60, %v2576_v61  ;;  %v2512_v41 = vsel %vm2439_vm3, %v2262_v48, %v2511_v51 }
 0x355   : > { %v2507_v49 = vsel %vm2443_vm7, %v2238_v34, %v2506_v55  ;;  %v2513_v16 = vsel %vm2441_vm5, %v2266_v3, %v2512_v41  ;;  %vm2607_vm10 = vcmp.eq.s32.totalorder %v4376_v5, 0 }
 0x356   : > { %v2489_v26 = vsel %vm2435_vm2, %v2158_v18, %v2488_v32  ;;  %v2581_v32 = vsel %vm637_vm8, %v2500_v27, 0.0  ;;  %v2514_v9 = vsel %vm2443_vm7, %v2270_v15, %v2513_v16  ;;  %v2583_v39 = vsel %vm637_vm8, %v2507_v49, 0.0 }
 0x357   : > { %v1720_v4 = vpop.permute.xlu1 %1719  ;;  %v1888_v45 = vpop.permute.xlu0 %1887  ;;  %v2490_v63 = vsel %vm2437_vm0, %v2162_v53, %v2489_v26  ;;  %v2585_v22 = vsel %vm637_vm8, %v2514_v9, 0.0 }
 0x358   : > { %v2166_v7 = vrot.slane %v1720_v4, %v3745_v12  ;;  %v2390_v25 = vrot.slane %v1888_v45, %v3745_v12 }
 0x35a   : > { %v2491_v14 = vsel %vm2439_vm3, %v2166_v7, %v2490_v63  ;;  %v2540_v59 = vsel %vm2439_vm3, %v2390_v25, %v3932_v20  ;;  %v2591_v20 = vsel %vm637_vm8, %v3946_v43, 0.0 }
 0x35b   : > { %v1726_v46 = vpop.permute.xlu1 %1725  ;;  %v1891_v13 = vpop.permute.xlu0 %1890  ;;  %v2492_v28 = vsel %vm2441_vm5, %v2170_v33, %v2491_v14 }
 0x35c   : > { %v2174_v11 = vrot.slane %v1726_v46, %v3745_v12  ;;  %v2394_v29 = vrot.slane %v1891_v13, %v3745_v12  ;;  %v4375_v13 = vld [vmem:[#allocation6_spill] sm:$0xff] }
 0x35d   : > { %vm2606_vm9 = vcmp.eq.s32.totalorder %v4375_v13, 0 }
 0x35e   : > { %v2493_v47 = vsel %vm2443_vm7, %v2174_v11, %v2492_v28  ;;  %v2541_v31 = vsel %vm2441_vm5, %v2394_v29, %v2540_v59 }
 0x35f   : > { %v2579_v18 = vsel %vm637_vm8, %v2493_v47, 0.0  ;;  %v1906_v2 = vpop.permute.xlu1 %1905  ;;  %v1894_v26 = vpop.permute.xlu0 %1893 }
 0x360   : > { %v2580_v8 = vadd.f32 %v2579_v18, %v2578_v0  ;;  %v2414_v4 = vrot.slane %v1906_v2, %v3745_v12  ;;  %v2398_v7 = vrot.slane %v1894_v26, %v3745_v12 }
 0x362   : > { %v2582_v37 = vadd.f32 %v2581_v32, %v2580_v8  ;;  %v2545_v45 = vsel %vm2435_vm2, %v2414_v4, %v3950_v38  ;;  %v2542_v19 = vsel %vm2443_vm7, %v2398_v7, %v2541_v31 }
 0x363   : > { %v1909_v36 = vpop.permute.xlu1 %1908  ;;  %v1915_v40 = vpop.permute.xlu0 %1914  ;;  %v2593_v42 = vsel %vm637_vm8, %v2542_v19, 0.0 }
 0x364   : > { %v2584_v53 = vadd.f32 %v2583_v39, %v2582_v37  ;;  %v2418_v27 = vrot.slane %v1909_v36, %v3745_v12  ;;  %v2426_v38 = vrot.slane %v1915_v40, %v3745_v12 }
 0x366   : > { %v2586_v52 = vadd.f32 %v2585_v22, %v2584_v53  ;;  %v2546_v58 = vsel %vm2437_vm0, %v2418_v27, %v2545_v45 }
 0x367   : > { %v1912_v30 = vpop.permute.xlu1 %1911 }
 0x368   : > { %v2422_v44 = vrot.slane %v1912_v30, %v3745_v12  ;;  %v2588_v63 = vadd.f32 %v2587_v10, %v2586_v52 }
 0x36a   : > { %v2547_v21 = vsel %vm2439_vm3, %v2422_v44, %v2546_v58  ;;  %v2590_v14 = vadd.f32 %v2589_v35, %v2588_v63 }
 0x36b   : > { %v1918_v56 = vpop.permute.xlu1 %1917  ;;  %v2548_v57 = vsel %vm2441_vm5, %v2426_v38, %v2547_v21 }
 0x36c   : > { %v2430_v62 = vrot.slane %v1918_v56, %v3745_v12  ;;  %v2592_v24 = vadd.f32 %v2591_v20, %v2590_v14 }
 0x36e   : > { %v2549_v60 = vsel %vm2443_vm7, %v2430_v62, %v2548_v57  ;;  %v2594_v33 = vadd.f32 %v2593_v42, %v2592_v24 }
 0x36f   : > { %v2595_v46 = vsel %vm637_vm8, %v2549_v60, 0.0  ;;  %vm2608_vm8 = vmand %vm2606_vm9, %vm2607_vm10 }
 0x370   : > { %v2596_v1 = vadd.f32 %v2595_v46, %v2594_v33 }
 0x372   : > { %2597 = vadd.xlane.f32.xlu0 %v2596_v1 }
 0x3fb   : > { %v2598_v43 = vpop.xlane.xlu0 %2597 }
 0x3fc   : > { %v2599_v34 = vrot.slane %v2598_v43, 4 }
 0x3fe   : > { %v2600_v50 = vadd.f32 %v2599_v34, %v2598_v43 }
 0x400   : > { %v2601_v48 = vrot.slane %v2600_v50, 2 }
 0x402   : > { %v2602_v61 = vadd.f32 %v2601_v48, %v2600_v50 }
 0x404   : > { %v2603_v12 = vrot.slane %v2602_v61, 1 }
 0x406   : > { %v2604_v11 = vadd.f32 %v2603_v12, %v2602_v61 }
 0x408   : > { %2725 = vpush %v2604_v11 }
 0x439   : > { %s2726_s17 = spop %2725 }
 0x43a   : > { %v2609_v23 = vstv %s2726_s17 }
 0x43b   : > { %v2610_v6 = vsel %vm2608_vm8, %v2609_v23, 0.0 }
 0x43c   : > { %2611 = vst [vmem:[%s164_s10] sm:$0xff] %v2610_v6 }
 0x43d   : > { %2785 = shalt.err (!%p2782_p3)
}
 0x43e   : > { %s2786_s29 = scalar_lea.hbm %s4280_s24, 128  ;;  %s2790_s5 = scalar_lea.hbm %s4318_s3, 384 }
 0x43f   : > { %p2787_p4 = scmp.ne.s32.totalorder %s4280_s24, %s2786_s29  ;;  %p2791_p9 = scmp.lt.s32.totalorder %s4280_s24, %s4318_s3 }
 0x440   : > { %p2792_p10 = scmp.lt.s32.totalorder %s2790_s5, %s2786_s29 }
 0x441   : > { %p2788_p7 = pnand %p2787_p4, %p2897_p5 }
 0x442   : > { %p2793_p11 = por %p2792_p10, %p2791_p9 }
 0x443   : > { %p2789_p8 = pneg %p2788_p7 }
 0x445   : > { %p2794_p12 = pnand %p2793_p11, %p2789_p8 }
 0x447   : > { %2797 = shalt.err (!%p2794_p12)
}
 0x448   : > { %2727 = dma.vmem_to_hbm [thread:$0]  (%p2897_p5), %s2627_s11, 128, %s4280_s24, %s2613_s25  }
 0x449 PF: > { %p2733_p13 = scmp.ge.s32.totalorder %s2832_s15, 2  ;;  %s2638_s8 = sand.u32 1, %s2820_s12  }
 0x44a   : > { %s2639_s9 = scalar_lea.sflag [#allocation3], %s2638_s8 }
 0x44b   : > { %p2730_p0 = pnand %p2733_p13, %p2901_p6 }
 0x44d   : > { %p2731_p1 = pneg %p2730_p0 }
 0x44f   : > { %2815 = dma.done.wait (%p2731_p1), %s2639_s9, 128  }
 0x450   : > { %2817 = vsyncadd (%p2731_p1), %s2639_s9, 4294967168  ;;  %p13_p2 = scmp.ge.s32.totalorder %s2884_s18, 5   ;;  %s4377_s12 = smov %s2824_s13 }
 0x451   : > { %s4378_s13 = smov %s2828_s14  ;;  %s4379_s14 = smov %s2895_s21 }
 0x452   : > { %s4380_s15 = smov %s2884_s18  ;;  %15 = sbr.rel (!%p13_p2) target bundleno = 3 (0x3), region = 67 }
 0x457   :  { %2644 = vsyncpa [#allocation3], 1 }
 0x458   :  { %2646 = vsyncpa [#allocation3 + $0x1], 1 }

</bundles_post_ra>
